<compile_context>
chip_gen: v5e
topology: v5e:2x2
jax: 0.10.0
libtpu: 0.0.40
codegen_flags: <defaults>
</compile_context>

<pallas_src>
import functools

import jax
import jax.numpy as jnp
from jax.experimental import pallas as pl
from jax.experimental.pallas import tpu as pltpu

_EPS = 1e-5
_EXPANSION = 4
_LANE = 128


def _rup(c, m=_LANE):
    return ((c + m - 1) // m) * m


# ---------------------------------------------------------------------------
# Fused kernel: one grid step == one block of Nb images (NHWC, channels
# padded to 128 lanes).  All matmuls are slab-level (M = Nb*H*W).
# ---------------------------------------------------------------------------
def _bottleneck_kernel(*refs, Nb, H, W, Ho, Wo, stride, has_proj):
    it = iter(refs)
    x_ref = next(it)                       # (Nb, H, W, Cin_p)
    w1_ref = next(it)                      # (Cin_p, P)
    b1_ref = next(it)                      # (1, P)
    w2_ref = next(it)                      # (9, P, P)  tap-major (kh*3+kw)
    b2_ref = next(it)                      # (1, P)
    w3_ref = next(it)                      # (P, Cout_p)
    b3_ref = next(it)                      # (1, Cout_p)
    ws_ref = next(it) if has_proj else None      # (Cin_p, Cout_p)
    bs_ref = next(it) if has_proj else None      # (1, Cout_p)
    sel_ref = next(it) if stride != 1 else None  # (Nb*Ho*Wo, Nb*H*W) 0/1
    o_ref = next(it)                       # (Nb, Ho*Wo, Cout_p)
    y1_scr = next(it)                      # VMEM (Nb, H+2, W+2, P) f32

    f32 = jnp.float32
    Cin_p = x_ref.shape[-1]
    P = w1_ref.shape[1]
    Cout_p = w3_ref.shape[1]
    Hp, Wp = H + 2, W + 2
    M = Nb * H * W

    # conv2 has padding=1 applied to y1, so the 1-pixel border of the scratch
    # must hold true zeros.  Zero ONLY the halo strips (the interior is fully
    # overwritten by conv1 below) and do it unconditionally: with "parallel"
    # semantics a program_id == 0 guard would be unsafe.
    y1_scr[:, 0:1, :, :] = jnp.zeros((Nb, 1, Wp, P), f32)
    y1_scr[:, Hp - 1:Hp, :, :] = jnp.zeros((Nb, 1, Wp, P), f32)
    y1_scr[:, 1:H + 1, 0:1, :] = jnp.zeros((Nb, H, 1, P), f32)
    y1_scr[:, 1:H + 1, Wp - 1:Wp, :] = jnp.zeros((Nb, H, 1, P), f32)

    # ---- stage 1: y1 = relu(x @ w1' + b1') as one slab matmul ---------------
    x_flat = x_ref[...].reshape(M, Cin_p).astype(f32)               # (M, Cin_p)
    y1 = jnp.maximum(
        jnp.dot(x_flat, w1_ref[...], preferred_element_type=f32) + b1_ref[...],
        0.0)                                                        # (M, P)
    y1_scr[:, 1:H + 1, 1:W + 1, :] = y1.reshape(Nb, H, W, P)

    # ---- stage 2: 3x3 conv as 9 accumulating slab matmuls (dense, stride 1) -
    acc = None
    for kh in range(3):
        for kw in range(3):
            a = y1_scr[:, kh:kh + H, kw:kw + W, :].reshape(M, P)
            t = jnp.dot(a, w2_ref[kh * 3 + kw], preferred_element_type=f32)
            acc = t if acc is None else acc + t
    y2 = jnp.maximum(acc + b2_ref[...], 0.0)                        # (M, P)

    # ---- stride: pick strided output pixels BEFORE conv3 / projection -------
    if stride != 1:
        sel = sel_ref[...]                                          # (Mo, M)
        y2 = jnp.dot(sel, y2, preferred_element_type=f32)           # (Mo, P)
        x_sc = jnp.dot(sel, x_flat, preferred_element_type=f32)     # (Mo, Cin_p)
    else:
        x_sc = x_flat

    # ---- stage 3 + shortcut + residual add + ReLU ---------------------------
    y3 = jnp.dot(y2, w3_ref[...], preferred_element_type=f32) + b3_ref[...]
    if has_proj:
        res = jnp.dot(x_sc, ws_ref[...],
                      preferred_element_type=f32) + bs_ref[...]
    else:
        res = x_sc                             # identity: Cin_p == Cout_p

    out = jnp.maximum(y3 + res, 0.0)                                # (Mo, Cout_p)
    o_ref[...] = out.reshape(Nb, Ho * Wo, Cout_p).astype(o_ref.dtype)


# ---------------------------------------------------------------------------
# Wrapper: BN folding, lane padding, batch blocking, BlockSpecs / grid.
# ---------------------------------------------------------------------------
def _fold_bn(params, name):
    g, b = params[f"{name}_g"], params[f"{name}_b"]
    rm, rv = params[f"{name}_rm"], params[f"{name}_rv"]
    s = g / jnp.sqrt(rv + _EPS)
    return s, b - rm * s


def _pad2(m, rows, cols):
    return jnp.pad(m, ((0, rows - m.shape[0]), (0, cols - m.shape[1])))


def _full_spec(shape):
    nd = len(shape)
    return pl.BlockSpec(shape, lambda n: (0,) * nd)


def _pick_batch_block(N, H, W, Cin_p, P, Cout_p, Ho, Wo, vmem_budget=24 << 20):
    """Largest divisor of N that fills the MXU M dim and fits VMEM."""
    per_img = 4 * (H * W * Cin_p              # x block
                   + (H + 2) * (W + 2) * P    # y1 scratch
                   + 3 * H * W * P            # conv2 intermediates (rough)
                   + 2 * Ho * Wo * Cout_p)    # y3 / out block
    cap = max(1, min(16, vmem_budget // (3 * per_img)))
    target = max(1, -(-256 // (H * W)))       # images needed for M >= 256
    nb = 1
    for cand in range(1, N + 1):
        if cand > cap:
            break
        if N % cand == 0:
            nb = cand
            if cand >= target:
                break
    return nb


def bottleneck_forward_nhwc(params, x_nhwc, stride):
    """NHWC in -> padded NHWC out (N, Ho, Wo, Cout_p).  Keep padded NHWC
    end-to-end in a full network; only the NCHW API slices/transposes."""
    N, H, W, Cin = x_nhwc.shape
    planes = params["w1"].shape[0]
    cout = params["w3"].shape[0]
    has_proj = "ws" in params
    assert stride == 1 or has_proj

    Cin_p, P, Cout_p = _rup(Cin), _rup(planes), _rup(cout)
    Ho = (H - 1) // stride + 1
    Wo = (W - 1) // stride + 1
    Nb = _pick_batch_block(N, H, W, Cin_p, P, Cout_p, Ho, Wo)
    assert N % Nb == 0

    # Fold BN scale into the weights (true constant folding), pad to 128 lanes.
    s1, b1f = _fold_bn(params, "bn1")
    s2, b2f = _fold_bn(params, "bn2")
    s3, b3f = _fold_bn(params, "bn3")
    w1 = _pad2(params["w1"][:, :, 0, 0].T * s1[None, :], Cin_p, P)
    w3 = _pad2(params["w3"][:, :, 0, 0].T * s3[None, :], P, Cout_p)
    w2_taps = jnp.stack([params["w2"][:, :, kh, kw].T * s2[None, :]
                         for kh in range(3) for kw in range(3)])  # (9, pl, pl)
    w2 = jnp.pad(w2_taps, ((0, 0), (0, P - planes), (0, P - planes)))
    b1 = jnp.pad(b1f, (0, P - planes)).reshape(1, P)
    b2 = jnp.pad(b2f, (0, P - planes)).reshape(1, P)
    b3 = jnp.pad(b3f, (0, Cout_p - cout)).reshape(1, Cout_p)

    # Input: lane padding only (the conv2 halo lives in the VMEM scratch).
    xp = jnp.pad(x_nhwc, ((0, 0), (0, 0), (0, 0), (0, Cin_p - Cin)))

    args = [xp, w1, b1, w2, b2, w3, b3]
    in_specs = [
        pl.BlockSpec((Nb, H, W, Cin_p), lambda n: (n, 0, 0, 0)),
        _full_spec((Cin_p, P)), _full_spec((1, P)),
        _full_spec((9, P, P)), _full_spec((1, P)),
        _full_spec((P, Cout_p)), _full_spec((1, Cout_p)),
    ]

    if has_proj:
        ss, bsf = _fold_bn(params, "bns")
        ws = _pad2(params["ws"][:, :, 0, 0].T * ss[None, :], Cin_p, Cout_p)
        bs = jnp.pad(bsf, (0, Cout_p - cout)).reshape(1, Cout_p)
        args += [ws, bs]
        in_specs += [_full_spec((Cin_p, Cout_p)), _full_spec((1, Cout_p))]

    if stride != 1:
        # Block-diagonal 0/1 selector picking rows (b, ho*stride, wo*stride)
        # out of the dense (b, h, w) slab; applied before conv3 / projection.
        src_img = ((stride * jnp.arange(Ho))[:, None] * W
                   + (stride * jnp.arange(Wo))[None, :]).reshape(-1)
        src = (jnp.arange(Nb)[:, None] * (H * W)
               + src_img[None, :]).reshape(-1)                 # (Nb*Ho*Wo,)
        sel = (jnp.arange(Nb * H * W)[None, :] ==
               src[:, None]).astype(jnp.float32)
        args.append(sel)
        in_specs.append(_full_spec((Nb * Ho * Wo, Nb * H * W)))

    kernel = functools.partial(_bottleneck_kernel, Nb=Nb, H=H, W=W, Ho=Ho,
                               Wo=Wo, stride=stride, has_proj=has_proj)

    out = pl.pallas_call(
        kernel,
        grid=(N // Nb,),
        in_specs=in_specs,
        out_specs=pl.BlockSpec((Nb, Ho * Wo, Cout_p), lambda n: (n, 0, 0)),
        out_shape=jax.ShapeDtypeStruct((N, Ho * Wo, Cout_p), x_nhwc.dtype),
        scratch_shapes=[pltpu.VMEM((Nb, H + 2, W + 2, P), jnp.float32)],
        compiler_params=pltpu.CompilerParams(
            dimension_semantics=("parallel",)),
    )(*args)

    return out.reshape(N, Ho, Wo, Cout_p)


def bottleneck_forward(params, x_nchw, stride):
    """Public API matching the PyTorch module layout (NCHW in / NCHW out)."""
    cout = params["w3"].shape[0]
    x = jnp.transpose(x_nchw, (0, 2, 3, 1))            # NHWC
    out = bottleneck_forward_nhwc(params, x, stride)
    return jnp.transpose(out[..., :cout], (0, 3, 1, 2))  # back to NCHW


# ---------------------------------------------------------------------------
# Parameter init (matches the PyTorch module's structure)
# ---------------------------------------------------------------------------
def init_bottleneck_params(key, in_planes, planes, stride):
    exp = _EXPANSION
    ks = jax.random.split(key, 20)

    def conv_w(k, cout, cin, kh, kw):
        fan_in = cin * kh * kw
        return (jax.random.normal(k, (cout, cin, kh, kw), jnp.float32)
                / jnp.sqrt(float(fan_in)))

    def bn(kg, kb, km, kv, c):
        return dict(
            g=1.0 + 0.1 * jax.random.normal(kg, (c,), jnp.float32),
            b=0.1 * jax.random.normal(kb, (c,), jnp.float32),
            rm=0.05 * jax.random.normal(km, (c,), jnp.float32),
            rv=1.0 + 0.1 * jnp.abs(jax.random.normal(kv, (c,), jnp.float32)),
        )

    p = {}
    p["w1"] = conv_w(ks[0], planes, in_planes, 1, 1)
    p["w2"] = conv_w(ks[1], planes, planes, 3, 3)
    p["w3"] = conv_w(ks[2], exp * planes, planes, 1, 1)
    for name, keys, c in (("bn1", ks[3:7], planes),
                          ("bn2", ks[7:11], planes),
                          ("bn3", ks[11:15], exp * planes)):
        d = bn(*keys, c)
        for k2, v in d.items():
            p[f"{name}_{k2}"] = v
    if stride != 1 or in_planes != exp * planes:
        p["ws"] = conv_w(ks[15], exp * planes, in_planes, 1, 1)
        d = bn(*ks[16:20], exp * planes)
        for k2, v in d.items():
            p[f"bns_{k2}"] = v
    return p


# ---------------------------------------------------------------------------
# Pure-JAX reference (for correctness check)
# ---------------------------------------------------------------------------
def bottleneck_reference(params, x, stride):
    def conv(z, w, st=1, pad=0):
        return jax.lax.conv_general_dilated(
            z, w, (st, st), [(pad, pad), (pad, pad)],
            dimension_numbers=("NCHW", "OIHW", "NCHW"))

    def bn(z, name):
        g = params[f"{name}_g"][None, :, None, None]
        b = params[f"{name}_b"][None, :, None, None]
        rm = params[f"{name}_rm"][None, :, None, None]
        rv = params[f"{name}_rv"][None, :, None, None]
        return (z - rm) / jnp.sqrt(rv + _EPS) * g + b

    out = jax.nn.relu(bn(conv(x, params["w1"]), "bn1"))
    out = jax.nn.relu(bn(conv(out, params["w2"], st=stride, pad=1), "bn2"))
    out = bn(conv(out, params["w3"]), "bn3")
    res = x
    if "ws" in params:
        res = bn(conv(x, params["ws"], st=stride), "bns")
    return jax.nn.relu(out + res)


# ---------------------------------------------------------------------------
if __name__ == "__main__":
    key = jax.random.PRNGKey(0)
    configs = [
        # (in_planes, planes, stride, N, H, W) -- projection shortcut, stride 2
        (8, 4, 2, 2, 8, 8),
        # identity shortcut (in_planes == 4*planes, stride == 1)
        (16, 4, 1, 2, 8, 8),
    ]
    for idx, (cin, planes, stride, n, h, w) in enumerate(configs):
        kp, kx, key = jax.random.split(key, 3)
        params = init_bottleneck_params(kp, cin, planes, stride)
        x = jax.random.normal(kx, (n, cin, h, w), jnp.float32)

        out = jax.block_until_ready(bottleneck_forward(params, x, stride))
        ref = jax.block_until_ready(bottleneck_reference(params, x, stride))
        assert out.shape == ref.shape, (out.shape, ref.shape)
        err = float(jnp.max(jnp.abs(out - ref)))
        assert jnp.allclose(out, ref, atol=1e-4, rtol=1e-4), (
            f"config {idx}: max err {err}")

    print("KERNEL_OK")
</pallas_src>

<mosaic_0001>
module attributes {stable_mosaic.version = 11 : i64} {
  func.func @_bottleneck_kernel(%arg0: i32, %arg1: memref<2x8x8x128xf32, #tpu.memory_space<vmem>>, %arg2: memref<128x128xf32, #tpu.memory_space<vmem>>, %arg3: memref<1x128xf32, #tpu.memory_space<vmem>>, %arg4: memref<9x128x128xf32, #tpu.memory_space<vmem>>, %arg5: memref<1x128xf32, #tpu.memory_space<vmem>>, %arg6: memref<128x128xf32, #tpu.memory_space<vmem>>, %arg7: memref<1x128xf32, #tpu.memory_space<vmem>>, %arg8: memref<128x128xf32, #tpu.memory_space<vmem>>, %arg9: memref<1x128xf32, #tpu.memory_space<vmem>>, %arg10: memref<32x128xf32, #tpu.memory_space<vmem>>, %arg11: memref<2x16x128xf32, #tpu.memory_space<vmem>>, %arg12: memref<2x10x10x128xf32, #tpu.memory_space<vmem>>) attributes {dimension_semantics = [#tpu.dimension_semantics<parallel>], iteration_bounds = array<i64: 1>, scalar_prefetch = 0 : i64, scratch_operands = 1 : i64, tpu.core_type = #tpu.core_type<tc>, window_params = [{transform_indices = @transform_0, window_bounds = array<i64: 2, 8, 8, 128>}, {pipeline_mode = #tpu.pipeline_mode<synchronous>, transform_indices = @transform_1, window_bounds = array<i64: 128, 128>}, {pipeline_mode = #tpu.pipeline_mode<synchronous>, transform_indices = @transform_2, window_bounds = array<i64: 1, 128>}, {pipeline_mode = #tpu.pipeline_mode<synchronous>, transform_indices = @transform_3, window_bounds = array<i64: 9, 128, 128>}, {pipeline_mode = #tpu.pipeline_mode<synchronous>, transform_indices = @transform_4, window_bounds = array<i64: 1, 128>}, {pipeline_mode = #tpu.pipeline_mode<synchronous>, transform_indices = @transform_5, window_bounds = array<i64: 128, 128>}, {pipeline_mode = #tpu.pipeline_mode<synchronous>, transform_indices = @transform_6, window_bounds = array<i64: 1, 128>}, {pipeline_mode = #tpu.pipeline_mode<synchronous>, transform_indices = @transform_7, window_bounds = array<i64: 128, 128>}, {pipeline_mode = #tpu.pipeline_mode<synchronous>, transform_indices = @transform_8, window_bounds = array<i64: 1, 128>}, {pipeline_mode = #tpu.pipeline_mode<synchronous>, transform_indices = @transform_9, window_bounds = array<i64: 32, 128>}, {transform_indices = @transform_10, window_bounds = array<i64: 2, 16, 128>}]} {
    %cst = arith.constant 0.000000e+00 : f32
    %0 = vector.broadcast %cst : f32 to vector<2x1x10x128xf32>
    %c0 = arith.constant 0 : index
    %c0_0 = arith.constant 0 : index
    %c0_1 = arith.constant 0 : index
    %c0_2 = arith.constant 0 : index
    %1 = vector.load %arg12[%c0, %c0_0, %c0_1, %c0_2] : memref<2x10x10x128xf32, #tpu.memory_space<vmem>>, vector<2x1x10x128xf32>
    tpu.vector_store %arg12[%c0, %c0_0, %c0_1, %c0_2], %0 {strides = array<i32>} : memref<2x10x10x128xf32, #tpu.memory_space<vmem>>, vector<2x1x10x128xf32>,
    %cst_3 = arith.constant 0.000000e+00 : f32
    %2 = vector.broadcast %cst_3 : f32 to vector<2x1x10x128xf32>
    %c0_4 = arith.constant 0 : index
    %c9 = arith.constant 9 : index
    %c0_5 = arith.constant 0 : index
    %c0_6 = arith.constant 0 : index
    %3 = vector.load %arg12[%c0_4, %c9, %c0_5, %c0_6] : memref<2x10x10x128xf32, #tpu.memory_space<vmem>>, vector<2x1x10x128xf32>
    tpu.vector_store %arg12[%c0_4, %c9, %c0_5, %c0_6], %2 {strides = array<i32>} : memref<2x10x10x128xf32, #tpu.memory_space<vmem>>, vector<2x1x10x128xf32>,
    %cst_7 = arith.constant 0.000000e+00 : f32
    %4 = vector.broadcast %cst_7 : f32 to vector<2x8x1x128xf32>
    %c0_8 = arith.constant 0 : index
    %c1 = arith.constant 1 : index
    %c0_9 = arith.constant 0 : index
    %c0_10 = arith.constant 0 : index
    %5 = vector.load %arg12[%c0_8, %c1, %c0_9, %c0_10] : memref<2x10x10x128xf32, #tpu.memory_space<vmem>>, vector<2x8x1x128xf32>
    tpu.vector_store %arg12[%c0_8, %c1, %c0_9, %c0_10], %4 {strides = array<i32>} : memref<2x10x10x128xf32, #tpu.memory_space<vmem>>, vector<2x8x1x128xf32>,
    %cst_11 = arith.constant 0.000000e+00 : f32
    %6 = vector.broadcast %cst_11 : f32 to vector<2x8x1x128xf32>
    %c0_12 = arith.constant 0 : index
    %c1_13 = arith.constant 1 : index
    %c9_14 = arith.constant 9 : index
    %c0_15 = arith.constant 0 : index
    %7 = vector.load %arg12[%c0_12, %c1_13, %c9_14, %c0_15] : memref<2x10x10x128xf32, #tpu.memory_space<vmem>>, vector<2x8x1x128xf32>
    tpu.vector_store %arg12[%c0_12, %c1_13, %c9_14, %c0_15], %6 {strides = array<i32>} : memref<2x10x10x128xf32, #tpu.memory_space<vmem>>, vector<2x8x1x128xf32>,
    %c0_16 = arith.constant 0 : index
    %c0_17 = arith.constant 0 : index
    %c0_18 = arith.constant 0 : index
    %c0_19 = arith.constant 0 : index
    %8 = vector.load %arg1[%c0_16, %c0_17, %c0_18, %c0_19] : memref<2x8x8x128xf32, #tpu.memory_space<vmem>>, vector<2x8x8x128xf32>
    %9 = vector.shape_cast %8 : vector<2x8x8x128xf32> to vector<128x128xf32>
    %c0_20 = arith.constant 0 : index
    %c0_21 = arith.constant 0 : index
    %10 = vector.load %arg2[%c0_20, %c0_21] : memref<128x128xf32, #tpu.memory_space<vmem>>, vector<128x128xf32>
    %cst_22 = arith.constant dense<0.000000e+00> : vector<128x128xf32>
    %11 = tpu.matmul %9, %10, %cst_22 {dimension_numbers = #tpu.dot_dimension_numbers<[1], [0], [0], [1], [0, 0, 1, 1], [], []>} : vector<128x128xf32>, vector<128x128xf32>, vector<128x128xf32> -> vector<128x128xf32>
    %c0_23 = arith.constant 0 : index
    %c0_24 = arith.constant 0 : index
    %12 = vector.load %arg3[%c0_23, %c0_24] : memref<1x128xf32, #tpu.memory_space<vmem>>, vector<1x128xf32>
    %13 = vector.broadcast %12 : vector<1x128xf32> to vector<128x128xf32>
    %14 = arith.addf %11, %13 : vector<128x128xf32>
    %cst_25 = arith.constant 0.000000e+00 : f32
    %15 = vector.broadcast %cst_25 : f32 to vector<128x128xf32>
    %16 = arith.maximumf %14, %15 : vector<128x128xf32>
    %17 = vector.shape_cast %16 : vector<128x128xf32> to vector<2x8x8x128xf32>
    %c0_26 = arith.constant 0 : index
    %c1_27 = arith.constant 1 : index
    %c1_28 = arith.constant 1 : index
    %c0_29 = arith.constant 0 : index
    %18 = vector.load %arg12[%c0_26, %c1_27, %c1_28, %c0_29] : memref<2x10x10x128xf32, #tpu.memory_space<vmem>>, vector<2x8x8x128xf32>
    tpu.vector_store %arg12[%c0_26, %c1_27, %c1_28, %c0_29], %17 {strides = array<i32>} : memref<2x10x10x128xf32, #tpu.memory_space<vmem>>, vector<2x8x8x128xf32>,
    %c0_30 = arith.constant 0 : index
    %c0_31 = arith.constant 0 : index
    %c0_32 = arith.constant 0 : index
    %c0_33 = arith.constant 0 : index
    %19 = vector.load %arg12[%c0_30, %c0_31, %c0_32, %c0_33] : memref<2x10x10x128xf32, #tpu.memory_space<vmem>>, vector<2x8x8x128xf32>
    %20 = vector.shape_cast %19 : vector<2x8x8x128xf32> to vector<128x128xf32>
    %c0_34 = arith.constant 0 : index
    %c0_35 = arith.constant 0 : index
    %c0_36 = arith.constant 0 : index
    %21 = vector.load %arg4[%c0_34, %c0_35, %c0_36] : memref<9x128x128xf32, #tpu.memory_space<vmem>>, vector<1x128x128xf32>
    %22 = vector.shape_cast %21 : vector<1x128x128xf32> to vector<128x128xf32>
    %cst_37 = arith.constant dense<0.000000e+00> : vector<128x128xf32>
    %23 = tpu.matmul %20, %22, %cst_37 {dimension_numbers = #tpu.dot_dimension_numbers<[1], [0], [0], [1], [0, 0, 1, 1], [], []>} : vector<128x128xf32>, vector<128x128xf32>, vector<128x128xf32> -> vector<128x128xf32>
    %c0_38 = arith.constant 0 : index
    %c0_39 = arith.constant 0 : index
    %c1_40 = arith.constant 1 : index
    %c0_41 = arith.constant 0 : index
    %24 = vector.load %arg12[%c0_38, %c0_39, %c1_40, %c0_41] : memref<2x10x10x128xf32, #tpu.memory_space<vmem>>, vector<2x8x8x128xf32>
    %25 = vector.shape_cast %24 : vector<2x8x8x128xf32> to vector<128x128xf32>
    %c1_42 = arith.constant 1 : index
    %c0_43 = arith.constant 0 : index
    %c0_44 = arith.constant 0 : index
    %26 = vector.load %arg4[%c1_42, %c0_43, %c0_44] : memref<9x128x128xf32, #tpu.memory_space<vmem>>, vector<1x128x128xf32>
    %27 = vector.shape_cast %26 : vector<1x128x128xf32> to vector<128x128xf32>
    %cst_45 = arith.constant dense<0.000000e+00> : vector<128x128xf32>
    %28 = tpu.matmul %25, %27, %cst_45 {dimension_numbers = #tpu.dot_dimension_numbers<[1], [0], [0], [1], [0, 0, 1, 1], [], []>} : vector<128x128xf32>, vector<128x128xf32>, vector<128x128xf32> -> vector<128x128xf32>
    %29 = arith.addf %23, %28 : vector<128x128xf32>
    %c0_46 = arith.constant 0 : index
    %c0_47 = arith.constant 0 : index
    %c2 = arith.constant 2 : index
    %c0_48 = arith.constant 0 : index
    %30 = vector.load %arg12[%c0_46, %c0_47, %c2, %c0_48] : memref<2x10x10x128xf32, #tpu.memory_space<vmem>>, vector<2x8x8x128xf32>
    %31 = vector.shape_cast %30 : vector<2x8x8x128xf32> to vector<128x128xf32>
    %c2_49 = arith.constant 2 : index
    %c0_50 = arith.constant 0 : index
    %c0_51 = arith.constant 0 : index
    %32 = vector.load %arg4[%c2_49, %c0_50, %c0_51] : memref<9x128x128xf32, #tpu.memory_space<vmem>>, vector<1x128x128xf32>
    %33 = vector.shape_cast %32 : vector<1x128x128xf32> to vector<128x128xf32>
    %cst_52 = arith.constant dense<0.000000e+00> : vector<128x128xf32>
    %34 = tpu.matmul %31, %33, %cst_52 {dimension_numbers = #tpu.dot_dimension_numbers<[1], [0], [0], [1], [0, 0, 1, 1], [], []>} : vector<128x128xf32>, vector<128x128xf32>, vector<128x128xf32> -> vector<128x128xf32>
    %35 = arith.addf %29, %34 : vector<128x128xf32>
    %c0_53 = arith.constant 0 : index
    %c1_54 = arith.constant 1 : index
    %c0_55 = arith.constant 0 : index
    %c0_56 = arith.constant 0 : index
    %36 = vector.load %arg12[%c0_53, %c1_54, %c0_55, %c0_56] : memref<2x10x10x128xf32, #tpu.memory_space<vmem>>, vector<2x8x8x128xf32>
    %37 = vector.shape_cast %36 : vector<2x8x8x128xf32> to vector<128x128xf32>
    %c3 = arith.constant 3 : index
    %c0_57 = arith.constant 0 : index
    %c0_58 = arith.constant 0 : index
    %38 = vector.load %arg4[%c3, %c0_57, %c0_58] : memref<9x128x128xf32, #tpu.memory_space<vmem>>, vector<1x128x128xf32>
    %39 = vector.shape_cast %38 : vector<1x128x128xf32> to vector<128x128xf32>
    %cst_59 = arith.constant dense<0.000000e+00> : vector<128x128xf32>
    %40 = tpu.matmul %37, %39, %cst_59 {dimension_numbers = #tpu.dot_dimension_numbers<[1], [0], [0], [1], [0, 0, 1, 1], [], []>} : vector<128x128xf32>, vector<128x128xf32>, vector<128x128xf32> -> vector<128x128xf32>
    %41 = arith.addf %35, %40 : vector<128x128xf32>
    %c0_60 = arith.constant 0 : index
    %c1_61 = arith.constant 1 : index
    %c1_62 = arith.constant 1 : index
    %c0_63 = arith.constant 0 : index
    %42 = vector.load %arg12[%c0_60, %c1_61, %c1_62, %c0_63] : memref<2x10x10x128xf32, #tpu.memory_space<vmem>>, vector<2x8x8x128xf32>
    %43 = vector.shape_cast %42 : vector<2x8x8x128xf32> to vector<128x128xf32>
    %c4 = arith.constant 4 : index
    %c0_64 = arith.constant 0 : index
    %c0_65 = arith.constant 0 : index
    %44 = vector.load %arg4[%c4, %c0_64, %c0_65] : memref<9x128x128xf32, #tpu.memory_space<vmem>>, vector<1x128x128xf32>
    %45 = vector.shape_cast %44 : vector<1x128x128xf32> to vector<128x128xf32>
    %cst_66 = arith.constant dense<0.000000e+00> : vector<128x128xf32>
    %46 = tpu.matmul %43, %45, %cst_66 {dimension_numbers = #tpu.dot_dimension_numbers<[1], [0], [0], [1], [0, 0, 1, 1], [], []>} : vector<128x128xf32>, vector<128x128xf32>, vector<128x128xf32> -> vector<128x128xf32>
    %47 = arith.addf %41, %46 : vector<128x128xf32>
    %c0_67 = arith.constant 0 : index
    %c1_68 = arith.constant 1 : index
    %c2_69 = arith.constant 2 : index
    %c0_70 = arith.constant 0 : index
    %48 = vector.load %arg12[%c0_67, %c1_68, %c2_69, %c0_70] : memref<2x10x10x128xf32, #tpu.memory_space<vmem>>, vector<2x8x8x128xf32>
    %49 = vector.shape_cast %48 : vector<2x8x8x128xf32> to vector<128x128xf32>
    %c5 = arith.constant 5 : index
    %c0_71 = arith.constant 0 : index
    %c0_72 = arith.constant 0 : index
    %50 = vector.load %arg4[%c5, %c0_71, %c0_72] : memref<9x128x128xf32, #tpu.memory_space<vmem>>, vector<1x128x128xf32>
    %51 = vector.shape_cast %50 : vector<1x128x128xf32> to vector<128x128xf32>
    %cst_73 = arith.constant dense<0.000000e+00> : vector<128x128xf32>
    %52 = tpu.matmul %49, %51, %cst_73 {dimension_numbers = #tpu.dot_dimension_numbers<[1], [0], [0], [1], [0, 0, 1, 1], [], []>} : vector<128x128xf32>, vector<128x128xf32>, vector<128x128xf32> -> vector<128x128xf32>
    %53 = arith.addf %47, %52 : vector<128x128xf32>
    %c0_74 = arith.constant 0 : index
    %c2_75 = arith.constant 2 : index
    %c0_76 = arith.constant 0 : index
    %c0_77 = arith.constant 0 : index
    %54 = vector.load %arg12[%c0_74, %c2_75, %c0_76, %c0_77] : memref<2x10x10x128xf32, #tpu.memory_space<vmem>>, vector<2x8x8x128xf32>
    %55 = vector.shape_cast %54 : vector<2x8x8x128xf32> to vector<128x128xf32>
    %c6 = arith.constant 6 : index
    %c0_78 = arith.constant 0 : index
    %c0_79 = arith.constant 0 : index
    %56 = vector.load %arg4[%c6, %c0_78, %c0_79] : memref<9x128x128xf32, #tpu.memory_space<vmem>>, vector<1x128x128xf32>
    %57 = vector.shape_cast %56 : vector<1x128x128xf32> to vector<128x128xf32>
    %cst_80 = arith.constant dense<0.000000e+00> : vector<128x128xf32>
    %58 = tpu.matmul %55, %57, %cst_80 {dimension_numbers = #tpu.dot_dimension_numbers<[1], [0], [0], [1], [0, 0, 1, 1], [], []>} : vector<128x128xf32>, vector<128x128xf32>, vector<128x128xf32> -> vector<128x128xf32>
    %59 = arith.addf %53, %58 : vector<128x128xf32>
    %c0_81 = arith.constant 0 : index
    %c2_82 = arith.constant 2 : index
    %c1_83 = arith.constant 1 : index
    %c0_84 = arith.constant 0 : index
    %60 = vector.load %arg12[%c0_81, %c2_82, %c1_83, %c0_84] : memref<2x10x10x128xf32, #tpu.memory_space<vmem>>, vector<2x8x8x128xf32>
    %61 = vector.shape_cast %60 : vector<2x8x8x128xf32> to vector<128x128xf32>
    %c7 = arith.constant 7 : index
    %c0_85 = arith.constant 0 : index
    %c0_86 = arith.constant 0 : index
    %62 = vector.load %arg4[%c7, %c0_85, %c0_86] : memref<9x128x128xf32, #tpu.memory_space<vmem>>, vector<1x128x128xf32>
    %63 = vector.shape_cast %62 : vector<1x128x128xf32> to vector<128x128xf32>
    %cst_87 = arith.constant dense<0.000000e+00> : vector<128x128xf32>
    %64 = tpu.matmul %61, %63, %cst_87 {dimension_numbers = #tpu.dot_dimension_numbers<[1], [0], [0], [1], [0, 0, 1, 1], [], []>} : vector<128x128xf32>, vector<128x128xf32>, vector<128x128xf32> -> vector<128x128xf32>
    %65 = arith.addf %59, %64 : vector<128x128xf32>
    %c0_88 = arith.constant 0 : index
    %c2_89 = arith.constant 2 : index
    %c2_90 = arith.constant 2 : index
    %c0_91 = arith.constant 0 : index
    %66 = vector.load %arg12[%c0_88, %c2_89, %c2_90, %c0_91] : memref<2x10x10x128xf32, #tpu.memory_space<vmem>>, vector<2x8x8x128xf32>
    %67 = vector.shape_cast %66 : vector<2x8x8x128xf32> to vector<128x128xf32>
    %c8 = arith.constant 8 : index
    %c0_92 = arith.constant 0 : index
    %c0_93 = arith.constant 0 : index
    %68 = vector.load %arg4[%c8, %c0_92, %c0_93] : memref<9x128x128xf32, #tpu.memory_space<vmem>>, vector<1x128x128xf32>
    %69 = vector.shape_cast %68 : vector<1x128x128xf32> to vector<128x128xf32>
    %cst_94 = arith.constant dense<0.000000e+00> : vector<128x128xf32>
    %70 = tpu.matmul %67, %69, %cst_94 {dimension_numbers = #tpu.dot_dimension_numbers<[1], [0], [0], [1], [0, 0, 1, 1], [], []>} : vector<128x128xf32>, vector<128x128xf32>, vector<128x128xf32> -> vector<128x128xf32>
    %71 = arith.addf %65, %70 : vector<128x128xf32>
    %c0_95 = arith.constant 0 : index
    %c0_96 = arith.constant 0 : index
    %72 = vector.load %arg5[%c0_95, %c0_96] : memref<1x128xf32, #tpu.memory_space<vmem>>, vector<1x128xf32>
    %73 = vector.broadcast %72 : vector<1x128xf32> to vector<128x128xf32>
    %74 = arith.addf %71, %73 : vector<128x128xf32>
    %cst_97 = arith.constant 0.000000e+00 : f32
    %75 = vector.broadcast %cst_97 : f32 to vector<128x128xf32>
    %76 = arith.maximumf %74, %75 : vector<128x128xf32>
    %c0_98 = arith.constant 0 : index
    %c0_99 = arith.constant 0 : index
    %77 = vector.load %arg10[%c0_98, %c0_99] : memref<32x128xf32, #tpu.memory_space<vmem>>, vector<32x128xf32>
    %cst_100 = arith.constant dense<0.000000e+00> : vector<32x128xf32>
    %78 = tpu.matmul %77, %76, %cst_100 {dimension_numbers = #tpu.dot_dimension_numbers<[1], [0], [0], [1], [0, 0, 1, 1], [], []>} : vector<32x128xf32>, vector<128x128xf32>, vector<32x128xf32> -> vector<32x128xf32>
    %cst_101 = arith.constant dense<0.000000e+00> : vector<32x128xf32>
    %79 = tpu.matmul %77, %9, %cst_101 {dimension_numbers = #tpu.dot_dimension_numbers<[1], [0], [0], [1], [0, 0, 1, 1], [], []>} : vector<32x128xf32>, vector<128x128xf32>, vector<32x128xf32> -> vector<32x128xf32>
    %c0_102 = arith.constant 0 : index
    %c0_103 = arith.constant 0 : index
    %80 = vector.load %arg6[%c0_102, %c0_103] : memref<128x128xf32, #tpu.memory_space<vmem>>, vector<128x128xf32>
    %cst_104 = arith.constant dense<0.000000e+00> : vector<32x128xf32>
    %81 = tpu.matmul %78, %80, %cst_104 {dimension_numbers = #tpu.dot_dimension_numbers<[1], [0], [0], [1], [0, 0, 1, 1], [], []>} : vector<32x128xf32>, vector<128x128xf32>, vector<32x128xf32> -> vector<32x128xf32>
    %c0_105 = arith.constant 0 : index
    %c0_106 = arith.constant 0 : index
    %82 = vector.load %arg7[%c0_105, %c0_106] : memref<1x128xf32, #tpu.memory_space<vmem>>, vector<1x128xf32>
    %83 = vector.broadcast %82 : vector<1x128xf32> to vector<32x128xf32>
    %84 = arith.addf %81, %83 : vector<32x128xf32>
    %c0_107 = arith.constant 0 : index
    %c0_108 = arith.constant 0 : index
    %85 = vector.load %arg8[%c0_107, %c0_108] : memref<128x128xf32, #tpu.memory_space<vmem>>, vector<128x128xf32>
    %cst_109 = arith.constant dense<0.000000e+00> : vector<32x128xf32>
    %86 = tpu.matmul %79, %85, %cst_109 {dimension_numbers = #tpu.dot_dimension_numbers<[1], [0], [0], [1], [0, 0, 1, 1], [], []>} : vector<32x128xf32>, vector<128x128xf32>, vector<32x128xf32> -> vector<32x128xf32>
    %c0_110 = arith.constant 0 : index
    %c0_111 = arith.constant 0 : index
    %87 = vector.load %arg9[%c0_110, %c0_111] : memref<1x128xf32, #tpu.memory_space<vmem>>, vector<1x128xf32>
    %88 = vector.broadcast %87 : vector<1x128xf32> to vector<32x128xf32>
    %89 = arith.addf %86, %88 : vector<32x128xf32>
    %90 = arith.addf %84, %89 : vector<32x128xf32>
    %cst_112 = arith.constant 0.000000e+00 : f32
    %91 = vector.broadcast %cst_112 : f32 to vector<32x128xf32>
    %92 = arith.maximumf %90, %91 : vector<32x128xf32>
    %93 = vector.shape_cast %92 : vector<32x128xf32> to vector<2x16x128xf32>
    %c0_113 = arith.constant 0 : index
    %c0_114 = arith.constant 0 : index
    %c0_115 = arith.constant 0 : index
    %94 = vector.load %arg11[%c0_113, %c0_114, %c0_115] : memref<2x16x128xf32, #tpu.memory_space<vmem>>, vector<2x16x128xf32>
    tpu.vector_store %arg11[%c0_113, %c0_114, %c0_115], %93 {strides = array<i32>} : memref<2x16x128xf32, #tpu.memory_space<vmem>>, vector<2x16x128xf32>,
    return
  }
  func.func @transform_0(%arg0: i32) -> (i32, i32, i32, i32) {
    %c0_i32 = arith.constant 0 : i32
    %c0_i32_0 = arith.constant 0 : i32
    %c0_i32_1 = arith.constant 0 : i32
    %c0_i32_2 = arith.constant 0 : i32
    return %arg0, %c0_i32, %c0_i32_0, %c0_i32_1 : i32, i32, i32, i32
  }
  func.func @transform_1(%arg0: i32) -> (i32, i32) {
    %c0_i32 = arith.constant 0 : i32
    %c0_i32_0 = arith.constant 0 : i32
    %c0_i32_1 = arith.constant 0 : i32
    return %c0_i32, %c0_i32_0 : i32, i32
  }
  func.func @transform_2(%arg0: i32) -> (i32, i32) {
    %c0_i32 = arith.constant 0 : i32
    %c0_i32_0 = arith.constant 0 : i32
    %c0_i32_1 = arith.constant 0 : i32
    return %c0_i32, %c0_i32_0 : i32, i32
  }
  func.func @transform_3(%arg0: i32) -> (i32, i32, i32) {
    %c0_i32 = arith.constant 0 : i32
    %c0_i32_0 = arith.constant 0 : i32
    %c0_i32_1 = arith.constant 0 : i32
    %c0_i32_2 = arith.constant 0 : i32
    return %c0_i32, %c0_i32_0, %c0_i32_1 : i32, i32, i32
  }
  func.func @transform_4(%arg0: i32) -> (i32, i32) {
    %c0_i32 = arith.constant 0 : i32
    %c0_i32_0 = arith.constant 0 : i32
    %c0_i32_1 = arith.constant 0 : i32
    return %c0_i32, %c0_i32_0 : i32, i32
  }
  func.func @transform_5(%arg0: i32) -> (i32, i32) {
    %c0_i32 = arith.constant 0 : i32
    %c0_i32_0 = arith.constant 0 : i32
    %c0_i32_1 = arith.constant 0 : i32
    return %c0_i32, %c0_i32_0 : i32, i32
  }
  func.func @transform_6(%arg0: i32) -> (i32, i32) {
    %c0_i32 = arith.constant 0 : i32
    %c0_i32_0 = arith.constant 0 : i32
    %c0_i32_1 = arith.constant 0 : i32
    return %c0_i32, %c0_i32_0 : i32, i32
  }
  func.func @transform_7(%arg0: i32) -> (i32, i32) {
    %c0_i32 = arith.constant 0 : i32
    %c0_i32_0 = arith.constant 0 : i32
    %c0_i32_1 = arith.constant 0 : i32
    return %c0_i32, %c0_i32_0 : i32, i32
  }
  func.func @transform_8(%arg0: i32) -> (i32, i32) {
    %c0_i32 = arith.constant 0 : i32
    %c0_i32_0 = arith.constant 0 : i32
    %c0_i32_1 = arith.constant 0 : i32
    return %c0_i32, %c0_i32_0 : i32, i32
  }
  func.func @transform_9(%arg0: i32) -> (i32, i32) {
    %c0_i32 = arith.constant 0 : i32
    %c0_i32_0 = arith.constant 0 : i32
    %c0_i32_1 = arith.constant 0 : i32
    return %c0_i32, %c0_i32_0 : i32, i32
  }
  func.func @transform_10(%arg0: i32) -> (i32, i32, i32) {
    %c0_i32 = arith.constant 0 : i32
    %c0_i32_0 = arith.constant 0 : i32
    %c0_i32_1 = arith.constant 0 : i32
    return %arg0, %c0_i32, %c0_i32_0 : i32, i32, i32
  }
}

</mosaic_0001>

<bundles_post_ra>
// kernel: tpu_custom_call.1
= control target key start
LH: loop header
LB: loop body
LE: loop exit
PB: predicated region body
PF: predicated region fallthrough
CT: control target
= control target key end

     0   :  { %15 = vsyncpa [#allocation4], 0  ;;  %s2346_s0 = inlined_call_operand.hbm [shape: f32[2,8,8,128], index: 0, kind: input, shape index: {}]   ;;  %s2347_s1 = inlined_call_operand.hbm [shape: f32[128,128], index: 1, kind: input, shape index: {}]   ;;  %s2348_s2 = inlined_call_operand.vmem [shape: f32[1,128], index: 2, kind: input, shape index: {}]   ;;  %s2349_s3 = inlined_call_operand.hbm [shape: f32[9,128,128], index: 3, kind: input, shape index: {}]   ;;  %s2350_s4 = inlined_call_operand.vmem [shape: f32[1,128], index: 4, kind: input, shape index: {}]   ;;  %s2351_s5 = inlined_call_operand.hbm [shape: f32[128,128], index: 5, kind: input, shape index: {}]   ;;  %s2352_s6 = inlined_call_operand.vmem [shape: f32[1,128], index: 6, kind: input, shape index: {}]   ;;  %s2353_s7 = inlined_call_operand.hbm [shape: f32[128,128], index: 7, kind: input, shape index: {}]   ;;  %s2354_s8 = inlined_call_operand.vmem [shape: f32[1,128], index: 8, kind: input, shape index: {}]   ;;  %s2355_s9 = inlined_call_operand.hbm [shape: f32[32,128], index: 9, kind: input, shape index: {}]   ;;  %s2356_s10 = inlined_call_operand.hbm [shape: f32[2,16,128], index: 10, kind: output, shape index: {}]  }
   0x1   :  { %16 = vsyncpa [#allocation7], 0 }
   0x2   :  { %17 = vsyncpa [#allocation10], 0 }
   0x3   :  { %18 = vsyncpa [#allocation13], 0 }
   0x4   :  { %19 = vsyncpa [#allocation5], 0  ;;  %s37_s15 = sshll.u32 %s2347_s1, 4  ;;  %s1770_s16 = smov [#allocation6]   ;;  %s38_s15 = int_to_ptr.hbm [resolvable:$true] %s37_s15 }
   0x5   :  { %s39_s17 = sshll.u32 %s1770_s16, 4  ;;  %s67_s20 = sshll.u32 %s2351_s5, 4  ;;  %s40_s17 = int_to_ptr.vmem [resolvable:$true] %s39_s17  ;;  %s68_s20 = int_to_ptr.hbm [resolvable:$true] %s67_s20 }
   0x6   :  { %s1771_s21 = smov 128   ;;  %s1772_s22 = smov 8  }
   0x7   :  { %45 = dma.hbm_to_vmem [thread:$0]  %s38_s15, 2048, %s40_s17, [#allocation7], %s1771_s21, %s1771_s21, %s1772_s22  }
   0x8   :  { %s1773_s23 = smov [#allocation9]   ;;  %s24_s1 = sshll.u32 %s2346_s0, 4  ;;  %s25_s1 = int_to_ptr.hbm [resolvable:$true] %s24_s1 }
   0x9   :  { %s69_s24 = sshll.u32 %s1773_s23, 4  ;;  %s52_s28 = sshll.u32 %s2349_s3, 4  ;;  %s70_s24 = int_to_ptr.vmem [resolvable:$true] %s69_s24  ;;  %s53_s28 = int_to_ptr.hbm [resolvable:$true] %s52_s28 }
   0xa   :  { %75 = dma.hbm_to_vmem [thread:$0]  %s68_s20, 2048, %s70_s24, [#allocation10], %s1771_s21, %s1771_s21, %s1772_s22  }
   0xb   :  { %s1774_s29 = smov [#allocation3]   ;;  %s1775_s11 = smov [#allocation8]  }
   0xc   :  { %s26_s30 = sshll.u32 %s1774_s29, 4  ;;  %s54_s0 = sshll.u32 %s1775_s11, 4  ;;  %s27_s30 = int_to_ptr.vmem [resolvable:$true] %s26_s30  ;;  %s55_s0 = int_to_ptr.vmem [resolvable:$true] %s54_s0 }
   0xd   :  { %32 = dma.hbm_to_vmem [thread:$0]  %s25_s1, 2048, %s27_s30, [#allocation4], %s1771_s21, %s1771_s21, %s1772_s22  }
   0xe   :  { %s82_s14 = sshll.u32 %s2353_s7, 4  ;;  %s97_s16 = sshll.u32 %s2355_s9, 4  ;;  %s83_s14 = int_to_ptr.hbm [resolvable:$true] %s82_s14  ;;  %s98_s16 = int_to_ptr.hbm [resolvable:$true] %s97_s16 }
   0xf   :  { %60 = dma.hbm_to_vmem [thread:$0]  %s53_s28, 18432, %s55_s0, [#allocation7], %s1771_s21, %s1771_s21, %s1772_s22  }
  0x10   :  { %s1776_s17 = smov [#allocation11]   ;;  %s1777_s19 = smov [#allocation12]  }
  0x11   :  { %s84_s18 = sshll.u32 %s1776_s17, 4  ;;  %s99_s7 = sshll.u32 %s1777_s19, 4  ;;  %s85_s18 = int_to_ptr.vmem [resolvable:$true] %s84_s18  ;;  %s100_s7 = int_to_ptr.vmem [resolvable:$true] %s99_s7 }
  0x12   :  { %90 = dma.hbm_to_vmem [thread:$0]  %s83_s14, 2048, %s85_s18, [#allocation10], %s1771_s21, %s1771_s21, %s1772_s22  }
  0x13   :  { %105 = dma.hbm_to_vmem [thread:$0]  %s98_s16, 512, %s100_s7, [#allocation13], %s1771_s21, %s1771_s21, %s1772_s22  }
  0x14   :  { %1760 = dma.done.wait [#allocation4], 2048  }
  0x15   :  { %1761 = vsyncadd [#allocation4], 4294965248 }
  0x16   :  { %1762 = dma.done.wait [#allocation7], 20480  }
  0x17   :  { %1763 = vsyncadd [#allocation7], 4294946816 }
  0x18   :  { %1764 = dma.done.wait [#allocation10], 4096  }
  0x19   :  { %1765 = vsyncadd [#allocation10], 4294963200 }
  0x1a   :  { %1766 = dma.done.wait [#allocation13], 512  }
  0x1b   :  { %1767 = vsyncadd [#allocation13], 4294966784  ;;  %v203_v0 = vld [vmem:[#allocation6 + $0x78] sm:$0xff]  ;;  %v202_v1 = vld [vmem:[#allocation6 + $0x70] sm:$0xff]  ;;  %s1513_s27 = sshll.u32 %s2356_s10, 4  ;;  %s1514_s27 = int_to_ptr.hbm [resolvable:$true] %s1513_s27 }
  0x1c   :  { %208 = vmatpush.msra.mxu0 %v203_v0  ;;  %1529 = vmatpush.msra.mxu2 %v203_v0  ;;  %v201_v2 = vld [vmem:[#allocation6 + $0x68] sm:$0xff]  ;;  %v200_v3 = vld [vmem:[#allocation6 + $0x60] sm:$0xff]  ;;  %v199_v4 = vld [vmem:[#allocation6 + $0x58] sm:$0xff] }
  0x1d   :  { %v198_v5 = vld [vmem:[#allocation6 + $0x50] sm:$0xff]  ;;  %v197_v6 = vld [vmem:[#allocation6 + $0x48] sm:$0xff]  ;;  %v196_v7 = vld [vmem:[#allocation6 + $0x40] sm:$0xff] }
  0x1e   :  { %209 = vmatpush.msra.mxu0 %v202_v1  ;;  %1530 = vmatpush.msra.mxu2 %v202_v1  ;;  %v195_v8 = vld [vmem:[#allocation6 + $0x38] sm:$0xff]  ;;  %v194_v9 = vld [vmem:[#allocation6 + $0x30] sm:$0xff]  ;;  %v193_v10 = vld [vmem:[#allocation6 + $0x28] sm:$0xff] }
  0x1f   :  { %v192_v11 = vld [vmem:[#allocation6 + $0x20] sm:$0xff]  ;;  %v191_v12 = vld [vmem:[#allocation6 + $0x18] sm:$0xff]  ;;  %v190_v13 = vld [vmem:[#allocation6 + $0x10] sm:$0xff] }
  0x20   :  { %210 = vmatpush.msra.mxu0 %v201_v2  ;;  %1531 = vmatpush.msra.mxu2 %v201_v2  ;;  %v189_v14 = vld [vmem:[#allocation6 + $0x8] sm:$0xff]  ;;  %v188_v15 = vld [vmem:[#allocation6] sm:$0xff]  ;;  %v174_v18 = vld [vmem:[#allocation3 + $0x10] sm:$0xff]  ;;  %v1778_v2 = vmov 0.0  }
  0x21   :  { %v172_v16 = vld [vmem:[#allocation3] sm:$0xff]  ;;  %v173_v17 = vld [vmem:[#allocation3 + $0x8] sm:$0xff]  ;;  %v175_v19 = vld [vmem:[#allocation3 + $0x18] sm:$0xff]  ;;  %130 = vst [vmem:[#allocation2] sm:$0xff] %v1778_v2 }
  0x22   :  { %211 = vmatpush.msra.mxu0 %v200_v3  ;;  %1532 = vmatpush.msra.mxu2 %v200_v3  ;;  %v176_v20 = vld [vmem:[#allocation3 + $0x20] sm:$0xff]  ;;  %v177_v21 = vld [vmem:[#allocation3 + $0x28] sm:$0xff]  ;;  %v178_v22 = vld [vmem:[#allocation3 + $0x30] sm:$0xff]  ;;  %131 = vst [vmem:[#allocation2 + $0x8] sm:$0x3] %v1778_v2 }
  0x23   :  { %v179_v23 = vld [vmem:[#allocation3 + $0x38] sm:$0xff]  ;;  %v184_v24 = vld [vmem:[#allocation3 + $0x60] sm:$0xff]  ;;  %v368_v27 = vld [vmem:[#allocation8 + $0xf0] sm:$0xff]  ;;  %132 = vst [vmem:[#allocation2 + $0xa0] sm:$0xff] %v1778_v2 }
  0x24   :  { %212 = vmatpush.msra.mxu0 %v199_v4  ;;  %1533 = vmatpush.msra.mxu2 %v199_v4  ;;  %v369_v25 = vld [vmem:[#allocation8 + $0xf8] sm:$0xff]  ;;  %v335_v28 = vld [vmem:[#allocation8 + $0x70] sm:$0xff]  ;;  %v367_v29 = vld [vmem:[#allocation8 + $0xe8] sm:$0xff]  ;;  %133 = vst [vmem:[#allocation2 + $0xa8] sm:$0x3] %v1778_v2 }
  0x25   :  { %370 = vmatpush.msra.mxu1 %v369_v25  ;;  %v336_v26 = vld [vmem:[#allocation8 + $0x78] sm:$0xff]  ;;  %1545 = vmatpush.msra.mxu3 %v369_v25  ;;  %v334_v30 = vld [vmem:[#allocation8 + $0x68] sm:$0xff]  ;;  %v366_v31 = vld [vmem:[#allocation8 + $0xe0] sm:$0xff]  ;;  %135 = vst [vmem:[#allocation2 + $0x90] sm:$0xff] %v1778_v2 }
  0x26   :  { %213 = vmatpush.msra.mxu0 %v198_v5  ;;  %1534 = vmatpush.msra.mxu2 %v198_v5  ;;  %v646_v32 = vld [vmem:[#allocation8 + $0x1f8] sm:$0xff]  ;;  %v180_v33 = vld [vmem:[#allocation3 + $0x40] sm:$0xff]  ;;  %v645_v35 = vld [vmem:[#allocation8 + $0x1f0] sm:$0xff]  ;;  %136 = vst [vmem:[#allocation2 + $0x98] sm:$0x3] %v1778_v2 }
  0x27   :  { %371 = vmatpush.msra.mxu1 %v368_v27  ;;  %1546 = vmatpush.msra.mxu3 %v368_v27  ;;  %v333_v34 = vld [vmem:[#allocation8 + $0x60] sm:$0xff]  ;;  %v185_v36 = vld [vmem:[#allocation3 + $0x68] sm:$0xff]  ;;  %v365_v37 = vld [vmem:[#allocation8 + $0xd8] sm:$0xff]  ;;  %137 = vst [vmem:[#allocation2 + $0x130] sm:$0xff] %v1778_v2 }
  0x28   :  { %214 = vmatpush.msra.mxu0 %v197_v6  ;;  %1535 = vmatpush.msra.mxu2 %v197_v6  ;;  %v332_v38 = vld [vmem:[#allocation8 + $0x58] sm:$0xff]  ;;  %v644_v39 = vld [vmem:[#allocation8 + $0x1e8] sm:$0xff]  ;;  %v364_v40 = vld [vmem:[#allocation8 + $0xd0] sm:$0xff]  ;;  %138 = vst [vmem:[#allocation2 + $0x138] sm:$0x3] %v1778_v2 }
  0x29   :  { %372 = vmatpush.msra.mxu1 %v367_v29  ;;  %1547 = vmatpush.msra.mxu3 %v367_v29  ;;  %v331_v41 = vld [vmem:[#allocation8 + $0x50] sm:$0xff]  ;;  %v643_v42 = vld [vmem:[#allocation8 + $0x1e0] sm:$0xff]  ;;  %v363_v43 = vld [vmem:[#allocation8 + $0xc8] sm:$0xff]  ;;  %140 = vst [vmem:[#allocation2 + $0x10] sm:$0x1] %v1778_v2 }
  0x2a   :  { %215 = vmatpush.msra.mxu0 %v196_v7  ;;  %1536 = vmatpush.msra.mxu2 %v196_v7  ;;  %v330_v44 = vld [vmem:[#allocation8 + $0x48] sm:$0xff]  ;;  %v642_v45 = vld [vmem:[#allocation8 + $0x1d8] sm:$0xff]  ;;  %v362_v46 = vld [vmem:[#allocation8 + $0xc0] sm:$0xff]  ;;  %141 = vst [vmem:[#allocation2 + $0x20] sm:$0x1] %v1778_v2 }
  0x2b   :  { %373 = vmatpush.msra.mxu1 %v366_v31  ;;  %1548 = vmatpush.msra.mxu3 %v366_v31  ;;  %v181_v47 = vld [vmem:[#allocation3 + $0x48] sm:$0xff]  ;;  %v329_v48 = vld [vmem:[#allocation8 + $0x40] sm:$0xff]  ;;  %v186_v49 = vld [vmem:[#allocation3 + $0x70] sm:$0xff]  ;;  %142 = vst [vmem:[#allocation2 + $0x30] sm:$0x1] %v1778_v2 }
  0x2c   :  { %216 = vmatpush.msra.mxu0 %v195_v8  ;;  %1537 = vmatpush.msra.mxu2 %v195_v8  ;;  %v361_v50 = vld [vmem:[#allocation8 + $0xb8] sm:$0xff]  ;;  %v641_v52 = vld [vmem:[#allocation8 + $0x1d0] sm:$0xff]  ;;  %v640_v55 = vld [vmem:[#allocation8 + $0x1c8] sm:$0xff]  ;;  %143 = vst [vmem:[#allocation2 + $0x40] sm:$0x1] %v1778_v2 }
  0x2d   :  { %374 = vmatpush.msra.mxu1 %v365_v37  ;;  %1549 = vmatpush.msra.mxu3 %v365_v37  ;;  %v328_v51 = vld [vmem:[#allocation8 + $0x38] sm:$0xff]  ;;  %v360_v53 = vld [vmem:[#allocation8 + $0xb0] sm:$0xff]  ;;  %v359_v56 = vld [vmem:[#allocation8 + $0xa8] sm:$0xff]  ;;  %144 = vst [vmem:[#allocation2 + $0x50] sm:$0x1] %v1778_v2 }
  0x2e   :  { %217 = vmatpush.msra.mxu0 %v194_v9  ;;  %1538 = vmatpush.msra.mxu2 %v194_v9  ;;  %v327_v54 = vld [vmem:[#allocation8 + $0x30] sm:$0xff]  ;;  %v326_v57 = vld [vmem:[#allocation8 + $0x28] sm:$0xff]  ;;  %v639_v58 = vld [vmem:[#allocation8 + $0x1c0] sm:$0xff]  ;;  %145 = vst [vmem:[#allocation2 + $0x60] sm:$0x1] %v1778_v2 }
  0x2f   :  { %375 = vmatpush.msra.mxu1 %v364_v40  ;;  %1550 = vmatpush.msra.mxu3 %v364_v40  ;;  %v358_v59 = vld [vmem:[#allocation8 + $0xa0] sm:$0xff]  ;;  %v182_v60 = vld [vmem:[#allocation3 + $0x50] sm:$0xff]  ;;  %v187_v62 = vld [vmem:[#allocation3 + $0x78] sm:$0xff]  ;;  %146 = vst [vmem:[#allocation2 + $0x70] sm:$0x1] %v1778_v2 }
  0x30   :  { %218 = vmatpush.msra.mxu0 %v193_v10  ;;  %1539 = vmatpush.msra.mxu2 %v193_v10  ;;  %v325_v61 = vld [vmem:[#allocation8 + $0x20] sm:$0xff]  ;;  %v357_v63 = vld [vmem:[#allocation8 + $0x98] sm:$0xff]  ;;  %v356_v3 = vld [vmem:[#allocation8 + $0x90] sm:$0xff]  ;;  %147 = vst [vmem:[#allocation2 + $0x80] sm:$0x1] %v1778_v2 }
  0x31   :  { %376 = vmatpush.msra.mxu1 %v363_v43  ;;  %1551 = vmatpush.msra.mxu3 %v363_v43  ;;  %v324_v0 = vld [vmem:[#allocation8 + $0x18] sm:$0xff]  ;;  %v355_v5 = vld [vmem:[#allocation8 + $0x88] sm:$0xff]  ;;  %v354_v6 = vld [vmem:[#allocation8 + $0x80] sm:$0xff]  ;;  %148 = vst [vmem:[#allocation2 + $0xb0] sm:$0x1] %v1778_v2 }
  0x32   :  { %219 = vmatpush.msra.mxu0 %v192_v11  ;;  %1540 = vmatpush.msra.mxu2 %v192_v11  ;;  %v638_v1 = vld [vmem:[#allocation8 + $0x1b8] sm:$0xff]  ;;  %v337_v7 = vld [vmem:[#allocation2 + $0x1] sm:$0xff]  ;;  %v323_v8 = vld [vmem:[#allocation8 + $0x10] sm:$0xff]  ;;  %149 = vst [vmem:[#allocation2 + $0xc0] sm:$0x1] %v1778_v2 }
  0x33   :  { %377 = vmatpush.msra.mxu1 %v362_v46  ;;  %1552 = vmatpush.msra.mxu3 %v362_v46  ;;  %v183_v4 = vld [vmem:[#allocation3 + $0x58] sm:$0xff]  ;;  %v637_v9 = vld [vmem:[#allocation8 + $0x1b0] sm:$0xff]  ;;  %v322_v10 = vld [vmem:[#allocation8 + $0x8] sm:$0xff]  ;;  %150 = vst [vmem:[#allocation2 + $0xd0] sm:$0x1] %v1778_v2 }
  0x34   :  { %220 = vmatpush.msra.mxu0 %v191_v12  ;;  %1541 = vmatpush.msra.mxu2 %v191_v12  ;;  %v636_v11 = vld [vmem:[#allocation8 + $0x1a8] sm:$0xff]  ;;  %v321_v12 = vld [vmem:[#allocation8] sm:$0xff]  ;;  %151 = vst [vmem:[#allocation2 + $0xe0] sm:$0x1] %v1778_v2 }
  0x35   :  { %378 = vmatpush.msra.mxu1 %v361_v50  ;;  %1553 = vmatpush.msra.mxu3 %v361_v50  ;;  %152 = vst [vmem:[#allocation2 + $0xf0] sm:$0x1] %v1778_v2 }
  0x36   :  { %221 = vmatpush.msra.mxu0 %v190_v13  ;;  %1542 = vmatpush.msra.mxu2 %v190_v13  ;;  %v635_v13 = vld [vmem:[#allocation8 + $0x1a0] sm:$0xff]  ;;  %153 = vst [vmem:[#allocation2 + $0x100] sm:$0x1] %v1778_v2 }
  0x37   :  { %379 = vmatpush.msra.mxu1 %v360_v53  ;;  %1554 = vmatpush.msra.mxu3 %v360_v53  ;;  %154 = vst [vmem:[#allocation2 + $0x110] sm:$0x1] %v1778_v2 }
  0x38   :  { %222 = vmatpush.msra.mxu0 %v189_v14  ;;  %1543 = vmatpush.msra.mxu2 %v189_v14  ;;  %v634_v14 = vld [vmem:[#allocation8 + $0x198] sm:$0xff]  ;;  %155 = vst [vmem:[#allocation2 + $0x120] sm:$0x1] %v1778_v2 }
  0x39   :  { %380 = vmatpush.msra.mxu1 %v359_v56  ;;  %1555 = vmatpush.msra.mxu3 %v359_v56  ;;  %156 = vst [vmem:[#allocation2 + $0x19] sm:$0x1] %v1778_v2  ;;  %v750_v56 = vld [vmem:[#allocation8 + $0x228] sm:$0xff] }
  0x3a   :  { %223 = vmatpush.msra.mxu0 %v188_v15  ;;  %1544 = vmatpush.msra.mxu2 %v188_v15  ;;  %v633_v15 = vld [vmem:[#allocation8 + $0x190] sm:$0xff]  ;;  %157 = vst [vmem:[#allocation2 + $0x29] sm:$0x1] %v1778_v2 }
  0x3b   :  { %224 = vmatmul.f32.vlgmr.msra.gmra.mxu0 %v172_v16  ;;  %260 = vmatmul.f32.vlgmr.msra.gmra.mxu2 %v184_v24  ;;  %v632_v16 = vld [vmem:[#allocation8 + $0x188] sm:$0xff]  ;;  %158 = vst [vmem:[#allocation2 + $0x39] sm:$0x1] %v1778_v2 }
  0x3c   :  { %435 = vmatpush.msrb.mxu2 %v336_v26  ;;  %647 = vmatpush.msrb.mxu0 %v646_v32  ;;  %159 = vst [vmem:[#allocation2 + $0x49] sm:$0x1] %v1778_v2 }
  0x3d   :  { %381 = vmatpush.msra.mxu1 %v358_v59  ;;  %1556 = vmatpush.msra.mxu3 %v358_v59  ;;  %160 = vst [vmem:[#allocation2 + $0x59] sm:$0x1] %v1778_v2 }
  0x3e   :  { %436 = vmatpush.msrb.mxu2 %v335_v28  ;;  %648 = vmatpush.msrb.mxu0 %v645_v35  ;;  %161 = vst [vmem:[#allocation2 + $0x69] sm:$0x1] %v1778_v2 }
  0x3f   :  { %382 = vmatpush.msra.mxu1 %v357_v63  ;;  %1557 = vmatpush.msra.mxu3 %v357_v63  ;;  %162 = vst [vmem:[#allocation2 + $0x79] sm:$0x1] %v1778_v2  ;;  %v748_v63 = vld [vmem:[#allocation8 + $0x218] sm:$0xff] }
  0x40   :  { %437 = vmatpush.msrb.mxu2 %v334_v30  ;;  %649 = vmatpush.msrb.mxu0 %v644_v39  ;;  %163 = vst [vmem:[#allocation2 + $0x89] sm:$0x1] %v1778_v2 }
  0x41   :  { %383 = vmatpush.msra.mxu1 %v356_v3  ;;  %1558 = vmatpush.msra.mxu3 %v356_v3  ;;  %164 = vst [vmem:[#allocation2 + $0xb9] sm:$0x1] %v1778_v2 }
  0x42   :  { %438 = vmatpush.msrb.mxu2 %v333_v34  ;;  %650 = vmatpush.msrb.mxu0 %v643_v42  ;;  %165 = vst [vmem:[#allocation2 + $0xc9] sm:$0x1] %v1778_v2  ;;  %v760_v34 = vld [vmem:[#allocation8 + $0x278] sm:$0xff] }
  0x43   :  { %227 = vmatmul.f32.gmra.mxu0 %v173_v17  ;;  %263 = vmatmul.f32.gmra.mxu2 %v185_v36  ;;  %v631_v17 = vld [vmem:[#allocation8 + $0x180] sm:$0xff]  ;;  %166 = vst [vmem:[#allocation2 + $0xd9] sm:$0x1] %v1778_v2  ;;  %v759_v36 = vld [vmem:[#allocation8 + $0x270] sm:$0xff]  ;;  %v756_v42 = vld [vmem:[#allocation8 + $0x258] sm:$0xff] }
  0x44   :  { %439 = vmatpush.msrb.mxu2 %v332_v38  ;;  %651 = vmatpush.msrb.mxu0 %v642_v45  ;;  %167 = vst [vmem:[#allocation2 + $0xe9] sm:$0x1] %v1778_v2  ;;  %v758_v38 = vld [vmem:[#allocation8 + $0x268] sm:$0xff] }
  0x45   :  { %384 = vmatpush.msra.mxu1 %v355_v5  ;;  %1559 = vmatpush.msra.mxu3 %v355_v5  ;;  %168 = vst [vmem:[#allocation2 + $0xf9] sm:$0x1] %v1778_v2 }
  0x46   :  { %440 = vmatpush.msrb.mxu2 %v331_v41  ;;  %652 = vmatpush.msrb.mxu0 %v641_v52  ;;  %169 = vst [vmem:[#allocation2 + $0x109] sm:$0x1] %v1778_v2  ;;  %v757_v41 = vld [vmem:[#allocation8 + $0x260] sm:$0xff] }
  0x47   :  { %385 = vmatpush.msra.mxu1 %v354_v6  ;;  %1560 = vmatpush.msra.mxu3 %v354_v6  ;;  %170 = vst [vmem:[#allocation2 + $0x119] sm:$0x1] %v1778_v2  ;;  %v746_v6 = vld [vmem:[#allocation8 + $0x208] sm:$0xff] }
  0x48   :  { %441 = vmatpush.msrb.mxu2 %v330_v44  ;;  %653 = vmatpush.msrb.mxu0 %v640_v55  ;;  %171 = vst [vmem:[#allocation2 + $0x129] sm:$0x1] %v1778_v2  ;;  %v755_v44 = vld [vmem:[#allocation8 + $0x250] sm:$0xff] }
  0x49   :  { %386 = vmatmul.f32.vlgmr.msra.gmra.mxu1 %v337_v7  ;;  %v751_v55 = vld [vmem:[#allocation8 + $0x230] sm:$0xff] }
  0x4a   :  { %442 = vmatpush.msrb.mxu2 %v329_v48  ;;  %654 = vmatpush.msrb.mxu0 %v639_v58  ;;  %v754_v48 = vld [vmem:[#allocation8 + $0x248] sm:$0xff]  ;;  %v749_v58 = vld [vmem:[#allocation8 + $0x220] sm:$0xff]  ;;  %v531_v7 = vld [vmem:[#allocation8 + $0x170] sm:$0xff] }
  0x4b   :  { %230 = vmatmul.f32.gmra.mxu0 %v174_v18  ;;  %266 = vmatmul.f32.gmra.mxu2 %v186_v49  ;;  %v1915_v18 = vld [vmem:[%s2348_s2] ss:$0 sm:$0xff] }
  0x4c   :  { %443 = vmatpush.msrb.mxu2 %v328_v51  ;;  %655 = vmatpush.msrb.mxu0 %v638_v1  ;;  %v753_v49 = vld [vmem:[#allocation8 + $0x240] sm:$0xff]  ;;  %v752_v51 = vld [vmem:[#allocation8 + $0x238] sm:$0xff] }
  0x4d   :  { %761 = vmatpush.msrb.mxu1 %v760_v34  ;;  %v532_v1 = vld [vmem:[#allocation8 + $0x178] sm:$0xff] }
  0x4e   :  { %444 = vmatpush.msrb.mxu2 %v327_v54  ;;  %656 = vmatpush.msrb.mxu0 %v637_v9  ;;  %v1103_v34 = vld [vmem:[#allocation8 + $0x3f8] sm:$0xff] }
  0x4f   :  { %762 = vmatpush.msrb.mxu1 %v759_v36  ;;  %533 = vmatpush.msrb.mxu3 %v532_v1  ;;  %v1102_v36 = vld [vmem:[#allocation8 + $0x3f0] sm:$0xff] }
  0x50   :  { %445 = vmatpush.msrb.mxu2 %v326_v57  ;;  %657 = vmatpush.msrb.mxu0 %v636_v11 }
  0x51   :  { %763 = vmatpush.msrb.mxu1 %v758_v38  ;;  %534 = vmatpush.msrb.mxu3 %v531_v7  ;;  %v863_v7 = vld [vmem:[#allocation8 + $0x2a0] sm:$0xff] }
  0x52   :  { %446 = vmatpush.msrb.mxu2 %v325_v61  ;;  %658 = vmatpush.msrb.mxu0 %v635_v13  ;;  %v345_v61 = vld [vmem:[#allocation2 + $0xa1] sm:$0xff] }
  0x53   :  { %233 = vmatmul.f32.gmra.mxu0 %v175_v19  ;;  %269 = vmatmul.f32.gmra.mxu2 %v187_v62  ;;  %v745_v13 = vld [vmem:[#allocation8 + $0x200] sm:$0xff] }
  0x54   :  { %447 = vmatpush.msrb.mxu2 %v324_v0  ;;  %659 = vmatpush.msrb.mxu0 %v634_v14  ;;  %v747_v0 = vld [vmem:[#allocation8 + $0x210] sm:$0xff]  ;;  %v529_v14 = vld [vmem:[#allocation8 + $0x160] sm:$0xff] }
  0x55   :  { %764 = vmatpush.msrb.mxu1 %v757_v41 }
  0x56   :  { %448 = vmatpush.msrb.mxu2 %v323_v8  ;;  %660 = vmatpush.msrb.mxu0 %v633_v15  ;;  %v874_v15 = vld [vmem:[#allocation8 + $0x2f8] sm:$0xff] }
  0x57   :  { %765 = vmatpush.msrb.mxu1 %v756_v42 }
  0x58   :  { %449 = vmatpush.msrb.mxu2 %v322_v10  ;;  %661 = vmatpush.msrb.mxu0 %v632_v16  ;;  %v530_v10 = vld [vmem:[#allocation8 + $0x168] sm:$0xff]  ;;  %v873_v16 = vld [vmem:[#allocation8 + $0x2f0] sm:$0xff] }
  0x59   :  { %766 = vmatpush.msrb.mxu1 %v755_v44  ;;  %535 = vmatpush.msrb.mxu3 %v530_v10  ;;  %v524_v44 = vld [vmem:[#allocation8 + $0x138] sm:$0xff] }
  0x5a   :  { %450 = vmatpush.msrb.mxu2 %v321_v12  ;;  %662 = vmatpush.msrb.mxu0 %v631_v17  ;;  %v528_v17 = vld [vmem:[#allocation8 + $0x158] sm:$0xff] }
  0x5b   :  { %236 = vmatmul.f32.gmra.mxu0 %v176_v20  ;;  %451 = vmatmul.f32.vlgmr.msrb.gmra.mxu2 %v1778_v2  ;;  %v862_v10 = vld [vmem:[#allocation8 + $0x298] sm:$0xff] }
  0x5c   :  { %767 = vmatpush.msrb.mxu1 %v754_v48  ;;  %875 = vmatpush.msra.mxu2 %v874_v15  ;;  %v1094_v15 = vld [vmem:[#allocation8 + $0x3b0] sm:$0xff] }
  0x5d   :  { %536 = vmatpush.msrb.mxu3 %v529_v14  ;;  %1104 = vmatpush.msra.mxu0 %v1103_v34  ;;  %v861_v14 = vld [vmem:[#allocation8 + $0x290] sm:$0xff] }
  0x5e   :  { %768 = vmatpush.msrb.mxu1 %v753_v49  ;;  %876 = vmatpush.msra.mxu2 %v873_v16  ;;  %v518_v16 = vld [vmem:[#allocation8 + $0x108] sm:$0xff] }
  0x5f   :  { %537 = vmatpush.msrb.mxu3 %v528_v17  ;;  %1105 = vmatpush.msra.mxu0 %v1102_v36  ;;  %v500_v36 = vld [vmem:[#allocation2 + $0x2] sm:$0xff] }
  0x60   :  { %769 = vmatpush.msrb.mxu1 %v752_v51 }
  0x62   :  { %770 = vmatpush.msrb.mxu1 %v751_v55  ;;  %v1099_v55 = vld [vmem:[#allocation8 + $0x3d8] sm:$0xff] }
  0x63   :  { %239 = vmatmul.f32.gmra.mxu0 %v177_v21 }
  0x64   :  { %771 = vmatpush.msrb.mxu1 %v750_v56  ;;  %v865_v56 = vld [vmem:[#allocation8 + $0x2b0] sm:$0xff] }
  0x66   :  { %772 = vmatpush.msrb.mxu1 %v749_v58 }
  0x68   :  { %773 = vmatpush.msrb.mxu1 %v748_v63  ;;  %v864_v63 = vld [vmem:[#allocation8 + $0x2a8] sm:$0xff] }
  0x6a   :  { %774 = vmatpush.msrb.mxu1 %v747_v0  ;;  %v521_v0 = vld [vmem:[#allocation8 + $0x120] sm:$0xff] }
  0x6b   :  { %242 = vmatmul.f32.gmra.mxu0 %v178_v22 }
  0x6c   :  { %775 = vmatpush.msrb.mxu1 %v746_v6 }
  0x6e   :  { %776 = vmatpush.msrb.mxu1 %v745_v13  ;;  %v519_v13 = vld [vmem:[#allocation8 + $0x110] sm:$0xff] }
  0x73   :  { %245 = vmatmul.f32.gmra.mxu0 %v179_v23 }
  0x7b   :  { %248 = vmatmul.f32.gmra.mxu0 %v180_v33 }
  0x83   :  { %251 = vmatmul.f32.gmra.mxu0 %v181_v47 }
  0x8b   :  { %254 = vmatmul.f32.gmra.mxu0 %v182_v60 }
  0x93   :  { %257 = vmatmul.f32.gmra.mxu0 %v183_v4 }
  0xb8   :  { %v225_v19 = vpop.f32.mrf.mxu0 }
  0xb9   :  { %v226_v20 = vadd.f32 %v1915_v18, %v225_v19 }
  0xbb   :  { %v1918_v21 = vmax.f32 %v226_v20, 0.0  ;;  %v872_v20 = vld [vmem:[#allocation8 + $0x2e8] sm:$0xff] }
  0xbc   :  { %877 = vmatpush.msra.mxu2 %v872_v20  ;;  %v1093_v20 = vld [vmem:[#allocation8 + $0x3a8] sm:$0xff] }
  0xbd   :  { %289 = vst [vmem:[#allocation2 + $0x11] sm:$0xff] %v1918_v21  ;;  %389 = vmatmul.f32.gmra.mxu1 %v1918_v21 }
  0xbe   :  { %v261_v3 = vpop.f32.mrf.mxu2 }
  0xbf   :  { %v262_v5 = vadd.f32 %v1915_v18, %v261_v3  ;;  %v1097_v3 = vld [vmem:[#allocation8 + $0x3c8] sm:$0xff] }
  0xc0   :  { %v228_v22 = vpop.f32.mrf.mxu0 }
  0xc1   :  { %v229_v23 = vadd.f32 %v1915_v18, %v228_v22  ;;  %v1958_v9 = vmax.f32 %v262_v5, 0.0 }
  0xc3   :  { %v1923_v24 = vmax.f32 %v229_v23, 0.0  ;;  %301 = vst [vmem:[#allocation2 + $0xf1] sm:$0xff] %v1958_v9 }
  0xc4   :  { %v306_v25 = vld [vmem:[#allocation2 + $0x10] sm:$0xff] }
  0xc5   :  { %290 = vst [vmem:[#allocation2 + $0x21] sm:$0xff] %v1923_v24  ;;  %454 = vmatmul.f32.gmra.mxu2 %v306_v25  ;;  %663 = vmatmul.f32.vlgmr.msrb.gmra.mxu0 %v306_v25  ;;  %v527_v25 = vld [vmem:[#allocation8 + $0x150] sm:$0xff] }
  0xc6   :  { %392 = vmatmul.f32.gmra.mxu1 %v1923_v24  ;;  %v264_v19 = vpop.f32.mrf.mxu2  ;;  %538 = vmatpush.msrb.mxu3 %v527_v25  ;;  %v1091_v25 = vld [vmem:[#allocation8 + $0x398] sm:$0xff]  ;;  %v2008_v34 = vpop.f32.mrf.mxu1 }
  0xc7   :  { %v265_v23 = vadd.f32 %v1915_v18, %v264_v19  ;;  %v860_v19 = vld [vmem:[#allocation8 + $0x288] sm:$0xff] }
  0xc8   :  { %v231_v26 = vpop.f32.mrf.mxu0 }
  0xc9   :  { %v232_v27 = vadd.f32 %v1915_v18, %v231_v26 }
  0xcb   :  { %v1928_v28 = vmax.f32 %v232_v27, 0.0  ;;  %v871_v27 = vld [vmem:[#allocation8 + $0x2e0] sm:$0xff] }
  0xcc   :  { %v307_v29 = vld [vmem:[#allocation2 + $0x20] sm:$0xff]  ;;  %878 = vmatpush.msra.mxu2 %v871_v27  ;;  %v1090_v27 = vld [vmem:[#allocation8 + $0x390] sm:$0xff] }
  0xcd   :  { %291 = vst [vmem:[#allocation2 + $0x31] sm:$0xff] %v1928_v28  ;;  %457 = vmatmul.f32.gmra.mxu2 %v307_v29  ;;  %666 = vmatmul.f32.gmra.mxu0 %v307_v29 }
  0xce   :  { %395 = vmatmul.f32.gmra.mxu1 %v1928_v28  ;;  %v267_v38 = vpop.f32.mrf.mxu2 }
  0xcf   :  { %v268_v42 = vadd.f32 %v1915_v18, %v267_v38 }
  0xd0   :  { %v234_v30 = vpop.f32.mrf.mxu0 }
  0xd1   :  { %v235_v31 = vadd.f32 %v1915_v18, %v234_v30  ;;  %v1977_v48 = vmax.f32 %v268_v42, 0.0 }
  0xd3   :  { %v1933_v32 = vmax.f32 %v235_v31, 0.0  ;;  %v526_v31 = vld [vmem:[#allocation8 + $0x148] sm:$0xff]  ;;  %303 = vst [vmem:[#allocation2 + $0x111] sm:$0xff] %v1977_v48 }
  0xd4   :  { %v308_v33 = vld [vmem:[#allocation2 + $0x30] sm:$0xff]  ;;  %539 = vmatpush.msrb.mxu3 %v526_v31  ;;  %v1088_v31 = vld [vmem:[#allocation8 + $0x380] sm:$0xff] }
  0xd5   :  { %292 = vst [vmem:[#allocation2 + $0x41] sm:$0xff] %v1933_v32  ;;  %460 = vmatmul.f32.gmra.mxu2 %v308_v33  ;;  %669 = vmatmul.f32.gmra.mxu0 %v308_v33  ;;  %v870_v33 = vld [vmem:[#allocation8 + $0x2d8] sm:$0xff] }
  0xd6   :  { %398 = vmatmul.f32.gmra.mxu1 %v1933_v32  ;;  %879 = vmatpush.msra.mxu2 %v870_v33  ;;  %v270_v58 = vpop.f32.mrf.mxu2 }
  0xd8   :  { %v237_v35 = vpop.f32.mrf.mxu0 }
  0xd9   :  { %v238_v37 = vadd.f32 %v1915_v18, %v237_v35  ;;  %v869_v35 = vld [vmem:[#allocation8 + $0x2d0] sm:$0xff] }
  0xda   :  { %880 = vmatpush.msra.mxu2 %v869_v35  ;;  %v2010_v35 = vld [vmem:[#allocation2 + $0x110] sm:$0xff] }
  0xdb   :  { %v1938_v39 = vmax.f32 %v238_v37, 0.0  ;;  %v525_v37 = vld [vmem:[#allocation8 + $0x140] sm:$0xff] }
  0xdc   :  { %v309_v40 = vld [vmem:[#allocation2 + $0x40] sm:$0xff]  ;;  %540 = vmatpush.msrb.mxu3 %v525_v37 }
  0xdd   :  { %293 = vst [vmem:[#allocation2 + $0x51] sm:$0xff] %v1938_v39  ;;  %463 = vmatmul.f32.gmra.mxu2 %v309_v40  ;;  %672 = vmatmul.f32.gmra.mxu0 %v309_v40  ;;  %v868_v40 = vld [vmem:[#allocation8 + $0x2c8] sm:$0xff] }
  0xde   :  { %401 = vmatmul.f32.gmra.mxu1 %v1938_v39  ;;  %881 = vmatpush.msra.mxu2 %v868_v40  ;;  %v842_v40 = vld [vmem:[#allocation2 + $0x12] sm:$0xff] }
  0xdf   :  { %541 = vmatpush.msrb.mxu3 %v524_v44 }
  0xe0   :  { %v240_v43 = vpop.f32.mrf.mxu0 }
  0xe1   :  { %v241_v45 = vadd.f32 %v1915_v18, %v240_v43  ;;  %v1101_v43 = vld [vmem:[#allocation8 + $0x3e8] sm:$0xff] }
  0xe2   :  { %1106 = vmatpush.msra.mxu0 %v1101_v43  ;;  %v2021_v43 = vld [vmem:[#allocation2 + $0x22] sm:$0xff] }
  0xe3   :  { %v1943_v46 = vmax.f32 %v241_v45, 0.0 }
  0xe4   :  { %v310_v47 = vld [vmem:[#allocation2 + $0x50] sm:$0xff] }
  0xe5   :  { %294 = vst [vmem:[#allocation2 + $0x61] sm:$0xff] %v1943_v46  ;;  %466 = vmatmul.f32.gmra.mxu2 %v310_v47  ;;  %675 = vmatmul.f32.gmra.mxu0 %v310_v47  ;;  %v867_v47 = vld [vmem:[#allocation8 + $0x2c0] sm:$0xff] }
  0xe6   :  { %404 = vmatmul.f32.gmra.mxu1 %v1943_v46  ;;  %882 = vmatpush.msra.mxu2 %v867_v47 }
  0xe8   :  { %v243_v50 = vpop.f32.mrf.mxu0 }
  0xe9   :  { %v244_v52 = vadd.f32 %v1915_v18, %v243_v50  ;;  %v1100_v50 = vld [vmem:[#allocation8 + $0x3e0] sm:$0xff] }
  0xea   :  { %1107 = vmatpush.msra.mxu0 %v1100_v50  ;;  %v2029_v50 = vld [vmem:[#allocation2 + $0x32] sm:$0xff] }
  0xeb   :  { %v1948_v53 = vmax.f32 %v244_v52, 0.0  ;;  %v523_v52 = vld [vmem:[#allocation8 + $0x130] sm:$0xff] }
  0xec   :  { %v311_v54 = vld [vmem:[#allocation2 + $0x60] sm:$0xff]  ;;  %542 = vmatpush.msrb.mxu3 %v523_v52  ;;  %1108 = vmatpush.msra.mxu0 %v1099_v55  ;;  %v1217_v55 = vld [vmem:[#allocation8 + $0x478] sm:$0xff] }
  0xed   :  { %295 = vst [vmem:[#allocation2 + $0x71] sm:$0xff] %v1948_v53  ;;  %469 = vmatmul.f32.gmra.mxu2 %v311_v54  ;;  %678 = vmatmul.f32.gmra.mxu0 %v311_v54  ;;  %v866_v54 = vld [vmem:[#allocation8 + $0x2b8] sm:$0xff] }
  0xee   :  { %407 = vmatmul.f32.gmra.mxu1 %v1948_v53  ;;  %883 = vmatpush.msra.mxu2 %v866_v54  ;;  %v2037_v54 = vld [vmem:[#allocation2 + $0x42] sm:$0xff] }
  0xef   :  { %1218 = vmatpush.msra.mxu1 %v1217_v55 }
  0xf0   :  { %v246_v57 = vpop.f32.mrf.mxu0  ;;  %884 = vmatpush.msra.mxu2 %v865_v56  ;;  %v1216_v56 = vld [vmem:[#allocation8 + $0x470] sm:$0xff] }
  0xf1   :  { %v247_v59 = vadd.f32 %v1915_v18, %v246_v57  ;;  %v522_v57 = vld [vmem:[#allocation8 + $0x128] sm:$0xff]  ;;  %1219 = vmatpush.msra.mxu1 %v1216_v56 }
  0xf2   :  { %543 = vmatpush.msrb.mxu3 %v522_v57  ;;  %885 = vmatpush.msra.mxu2 %v864_v63  ;;  %v1212_v63 = vld [vmem:[#allocation8 + $0x450] sm:$0xff] }
  0xf3   :  { %v1953_v60 = vmax.f32 %v247_v59, 0.0  ;;  %v1098_v59 = vld [vmem:[#allocation8 + $0x3d0] sm:$0xff] }
  0xf4   :  { %v312_v62 = vld [vmem:[#allocation2 + $0x70] sm:$0xff]  ;;  %1109 = vmatpush.msra.mxu0 %v1098_v59  ;;  %544 = vmatpush.msrb.mxu3 %v521_v0 }
  0xf5   :  { %296 = vst [vmem:[#allocation2 + $0x81] sm:$0xff] %v1953_v60  ;;  %472 = vmatmul.f32.gmra.mxu2 %v312_v62  ;;  %681 = vmatmul.f32.gmra.mxu0 %v312_v62  ;;  %v271_v62 = vadd.f32 %v1915_v18, %v270_v58  ;;  %v1215_v58 = vld [vmem:[#allocation8 + $0x468] sm:$0xff] }
  0xf6   :  { %410 = vmatmul.f32.gmra.mxu1 %v345_v61  ;;  %1110 = vmatpush.msra.mxu0 %v1097_v3  ;;  %v2053_v3 = vld [vmem:[#allocation2 + $0x62] sm:$0xff] }
  0xf7   :  { %886 = vmatpush.msra.mxu2 %v863_v7  ;;  %1220 = vmatpush.msra.mxu1 %v1215_v58  ;;  %v983_v58 = vld [vmem:[#allocation8 + $0x348] sm:$0xff] }
  0xf8   :  { %v249_v4 = vpop.f32.mrf.mxu0 }
  0xf9   :  { %v250_v8 = vadd.f32 %v1915_v18, %v249_v4  ;;  %v1986_v4 = vmax.f32 %v271_v62, 0.0  ;;  %887 = vmatpush.msra.mxu2 %v862_v10  ;;  %v1214_v62 = vld [vmem:[#allocation8 + $0x460] sm:$0xff] }
  0xfa   :  { %1221 = vmatpush.msra.mxu1 %v1214_v62 }
  0xfb   :  { %v1960_v11 = vmax.f32 %v250_v8, 0.0  ;;  %304 = vst [vmem:[#allocation2 + $0x121] sm:$0xff] %v1986_v4  ;;  %v1096_v8 = vld [vmem:[#allocation8 + $0x3c0] sm:$0xff]  ;;  %888 = vmatpush.msra.mxu2 %v861_v14 }
  0xfc   :  { %v621_v12 = vld [vmem:[#allocation2 + $0x80] sm:$0xff]  ;;  %1111 = vmatpush.msra.mxu0 %v1096_v8  ;;  %v1209_v8 = vld [vmem:[#allocation8 + $0x438] sm:$0xff] }
  0xfd   :  { %297 = vst [vmem:[#allocation2 + $0xb1] sm:$0xff] %v1960_v11  ;;  %475 = vmatmul.f32.gmra.mxu2 %v1778_v2  ;;  %684 = vmatmul.f32.gmra.mxu0 %v621_v12  ;;  %v1968_v2 = vmax.f32 %v265_v23, 0.0  ;;  %v1095_v12 = vld [vmem:[#allocation8 + $0x3b8] sm:$0xff]  ;;  %v1092_v23 = vld [vmem:[#allocation8 + $0x3a0] sm:$0xff] }
  0xfe   :  { %413 = vmatmul.f32.gmra.mxu1 %v1960_v11  ;;  %1112 = vmatpush.msra.mxu0 %v1095_v12  ;;  %v2061_v12 = vld [vmem:[#allocation2 + $0x72] sm:$0xff] }
  0xff   :  { %302 = vst [vmem:[#allocation2 + $0x101] sm:$0xff] %v1968_v2  ;;  %889 = vmatpush.msra.mxu2 %v860_v19  ;;  %v508_v19 = vld [vmem:[#allocation2 + $0xa2] sm:$0xff] }
 0x100   :  { %v252_v22 = vpop.f32.mrf.mxu0  ;;  %1113 = vmatpush.msra.mxu0 %v1094_v15  ;;  %v1206_v15 = vld [vmem:[#allocation8 + $0x420] sm:$0xff] }
 0x101   :  { %v253_v26 = vadd.f32 %v1915_v18, %v252_v22  ;;  %v859_v22 = vld [vmem:[#allocation8 + $0x280] sm:$0xff] }
 0x102   :  { %1114 = vmatpush.msra.mxu0 %v1093_v20  ;;  %890 = vmatpush.msra.mxu2 %v859_v22  ;;  %v2015_v37 = vld [vmem:[#allocation2 + $0x120] sm:$0xff]  ;;  %v989_v22 = vld [vmem:[#allocation8 + $0x378] sm:$0xff] }
 0x103   :  { %v1970_v29 = vmax.f32 %v253_v26, 0.0  ;;  %v1996_v26 = vld [vmem:[#allocation2 + $0xf0] sm:$0xff]  ;;  %v2071_v20 = vld [vmem:[#allocation2 + $0x82] sm:$0xff] }
 0x104   :  { %v314_v30 = vld [vmem:[#allocation2 + $0xb0] sm:$0xff]  ;;  %1115 = vmatpush.msra.mxu0 %v1092_v23 }
 0x105   :  { %298 = vst [vmem:[#allocation2 + $0xc1] sm:$0xff] %v1970_v29  ;;  %478 = vmatmul.f32.gmra.mxu2 %v314_v30  ;;  %687 = vmatmul.f32.gmra.mxu0 %v314_v30  ;;  %v1089_v30 = vld [vmem:[#allocation8 + $0x388] sm:$0xff] }
 0x106   :  { %416 = vmatmul.f32.gmra.mxu1 %v1970_v29  ;;  %1116 = vmatpush.msra.mxu0 %v1091_v25  ;;  %v2002_v33 = vld [vmem:[#allocation2 + $0x100] sm:$0xff]  ;;  %v1203_v25 = vld [vmem:[#allocation8 + $0x408] sm:$0xff] }
 0x108   :  { %v255_v41 = vpop.f32.mrf.mxu0  ;;  %1117 = vmatpush.msra.mxu0 %v1090_v27  ;;  %v988_v27 = vld [vmem:[#allocation8 + $0x370] sm:$0xff] }
 0x109   :  { %v256_v45 = vadd.f32 %v1915_v18, %v255_v41  ;;  %v2018_v41 = vpop.f32.mrf.mxu2 }
 0x10a   :  { %1118 = vmatpush.msra.mxu0 %v1089_v30 }
 0x10b   :  { %v1979_v49 = vmax.f32 %v256_v45, 0.0 }
 0x10c   :  { %v315_v51 = vld [vmem:[#allocation2 + $0xc0] sm:$0xff]  ;;  %1119 = vmatpush.msra.mxu0 %v1088_v31 }
 0x10d   :  { %299 = vst [vmem:[#allocation2 + $0xd1] sm:$0xff] %v1979_v49  ;;  %481 = vmatmul.f32.gmra.mxu2 %v315_v51  ;;  %690 = vmatmul.f32.gmra.mxu0 %v315_v51  ;;  %v2089_v56 = vld [vmem:[#allocation2 + $0xc2] sm:$0xff] }
 0x10e   :  { %419 = vmatmul.f32.gmra.mxu1 %v1979_v49 }
 0x110   :  { %v258_v61 = vpop.f32.mrf.mxu0 }
 0x111   :  { %v259_v1 = vadd.f32 %v1915_v18, %v258_v61  ;;  %v520_v18 = vld [vmem:[#allocation8 + $0x118] sm:$0xff] }
 0x112   :  { %545 = vmatpush.msrb.mxu3 %v520_v18  ;;  %v2045_v61 = vld [vmem:[#allocation2 + $0x52] sm:$0xff] }
 0x113   :  { %v1988_v5 = vmax.f32 %v259_v1, 0.0 }
 0x114   :  { %v316_v6 = vld [vmem:[#allocation2 + $0xd0] sm:$0xff]  ;;  %546 = vmatpush.msrb.mxu3 %v519_v13 }
 0x115   :  { %300 = vst [vmem:[#allocation2 + $0xe1] sm:$0xff] %v1988_v5  ;;  %484 = vmatmul.f32.gmra.mxu2 %v316_v6  ;;  %693 = vmatmul.f32.gmra.mxu0 %v316_v6  ;;  %v1211_v6 = vld [vmem:[#allocation8 + $0x448] sm:$0xff]  ;;  %v1208_v13 = vld [vmem:[#allocation8 + $0x430] sm:$0xff] }
 0x116   :  { %422 = vmatmul.f32.vlgmr.msra.gmra.mxu3 %v1988_v5  ;;  %777 = vmatmul.f32.vlgmr.msrb.gmra.mxu1 %v1918_v21  ;;  %v517_v21 = vld [vmem:[#allocation8 + $0x100] sm:$0xff] }
 0x117   :  { %547 = vmatpush.msrb.mxu3 %v518_v16 }
 0x119   :  { %548 = vmatpush.msrb.mxu3 %v517_v21  ;;  %v1205_v21 = vld [vmem:[#allocation8 + $0x418] sm:$0xff] }
 0x11b   :  { %990 = vmatpush.msra.mxu3 %v989_v22  ;;  %v1575_v22 = vld [vmem:[#allocation3 + $0x78] sm:$0xff] }
 0x11c   :  { %v317_v17 = vld [vmem:[#allocation2 + $0xe0] sm:$0xff] }
 0x11d   :  { %487 = vmatmul.f32.gmra.mxu2 %v317_v17  ;;  %696 = vmatmul.f32.gmra.mxu0 %v317_v17 }
 0x11e   :  { %425 = vmatmul.f32.gmra.mxu3 %v1958_v9  ;;  %780 = vmatmul.f32.gmra.mxu1 %v1923_v24 }
 0x11f   :  { %991 = vmatpush.msra.mxu3 %v988_v27  ;;  %v1576_v27 = vld [vmem:[#allocation3 + $0x70] sm:$0xff] }
 0x125   :  { %490 = vmatmul.f32.gmra.mxu2 %v1996_v26  ;;  %699 = vmatmul.f32.gmra.mxu0 %v1996_v26 }
 0x126   :  { %428 = vmatmul.f32.gmra.mxu3 %v1968_v2  ;;  %783 = vmatmul.f32.gmra.mxu1 %v1928_v28 }
 0x12d   :  { %493 = vmatmul.f32.gmra.mxu2 %v2002_v33  ;;  %702 = vmatmul.f32.gmra.mxu0 %v2002_v33 }
 0x12e   :  { %431 = vmatmul.f32.gmra.mxu3 %v1977_v48  ;;  %786 = vmatmul.f32.gmra.mxu1 %v1933_v32 }
 0x135   :  { %496 = vmatmul.f32.gmra.mxu2 %v2010_v35  ;;  %705 = vmatmul.f32.gmra.mxu0 %v2010_v35 }
 0x136   :  { %549 = vmatmul.f32.vlgmr.msrb.gmra.mxu3 %v500_v36  ;;  %789 = vmatmul.f32.gmra.mxu1 %v1938_v39  ;;  %v1078_v36 = vld [vmem:[#allocation2 + $0x91] sm:$0xff] }
 0x13a   :  { %v390_v38 = vpop.f32.mrf.mxu1 }
 0x13d   :  { %708 = vmatmul.f32.gmra.mxu0 %v2015_v37  ;;  %891 = vmatmul.f32.vlgmr.msra.gmra.mxu2 %v842_v40 }
 0x13e   :  { %552 = vmatmul.f32.gmra.mxu3 %v842_v40  ;;  %792 = vmatmul.f32.gmra.mxu1 %v1943_v46 }
 0x142   :  { %v2076_v30 = vpop.f32.mrf.mxu0 }
 0x143   :  { %v393_v42 = vpop.f32.mrf.mxu1 }
 0x145   :  { %894 = vmatmul.f32.gmra.mxu2 %v2021_v43  ;;  %1120 = vmatmul.f32.vlgmr.msra.gmra.mxu0 %v1923_v24 }
 0x146   :  { %555 = vmatmul.f32.gmra.mxu3 %v2021_v43  ;;  %795 = vmatmul.f32.gmra.mxu1 %v1948_v53 }
 0x148   :  { %v455_v44 = vpop.f32.mrf.mxu2 }
 0x149   :  { %v2027_v45 = vadd.f32 %v455_v44, %v390_v38  ;;  %v987_v38 = vld [vmem:[#allocation8 + $0x368] sm:$0xff]  ;;  %v986_v44 = vld [vmem:[#allocation8 + $0x360] sm:$0xff] }
 0x14a   :  { %992 = vmatpush.msra.mxu3 %v987_v38  ;;  %v2085_v55 = vpop.f32.mrf.mxu0  ;;  %v2139_v38 = vld [vmem:[#allocation2 + $0x102] sm:$0xff] }
 0x14b   :  { %v396_v47 = vpop.f32.mrf.mxu1 }
 0x14c   :  { %993 = vmatpush.msra.mxu3 %v986_v44  ;;  %v1579_v44 = vld [vmem:[#allocation3 + $0x58] sm:$0xff] }
 0x14d   :  { %897 = vmatmul.f32.gmra.mxu2 %v2029_v50  ;;  %1123 = vmatmul.f32.gmra.mxu0 %v1928_v28 }
 0x14e   :  { %558 = vmatmul.f32.gmra.mxu3 %v2029_v50  ;;  %798 = vmatmul.f32.gmra.mxu1 %v1953_v60 }
 0x150   :  { %v458_v51 = vpop.f32.mrf.mxu2 }
 0x151   :  { %v2035_v24 = vadd.f32 %v458_v51, %v393_v42  ;;  %v1202_v42 = vld [vmem:[#allocation8 + $0x400] sm:$0xff] }
 0x153   :  { %v399_v52 = vpop.f32.mrf.mxu1 }
 0x155   :  { %900 = vmatmul.f32.gmra.mxu2 %v2037_v54  ;;  %1126 = vmatmul.f32.gmra.mxu0 %v1933_v32  ;;  %v1213_v32 = vld [vmem:[#allocation8 + $0x458] sm:$0xff] }
 0x156   :  { %561 = vmatmul.f32.gmra.mxu3 %v2037_v54  ;;  %801 = vmatmul.f32.gmra.mxu1 %v1960_v11 }
 0x157   :  { %1222 = vmatpush.msra.mxu1 %v1213_v32  ;;  %v981_v32 = vld [vmem:[#allocation8 + $0x338] sm:$0xff] }
 0x158   :  { %v461_v28 = vpop.f32.mrf.mxu2 }
 0x159   :  { %v2043_v57 = vadd.f32 %v461_v28, %v396_v47  ;;  %1223 = vmatpush.msra.mxu1 %v1212_v63  ;;  %v985_v47 = vld [vmem:[#allocation8 + $0x358] sm:$0xff] }
 0x15a   :  { %994 = vmatpush.msra.mxu3 %v985_v47  ;;  %v2099_v63 = vld [vmem:[#allocation2 + $0xd2] sm:$0xff] }
 0x15b   :  { %v402_v59 = vpop.f32.mrf.mxu1  ;;  %1224 = vmatpush.msra.mxu1 %v1211_v6  ;;  %v2101_v6 = vpop.f32.mrf.mxu0 }
 0x15d   :  { %903 = vmatmul.f32.gmra.mxu2 %v2045_v61  ;;  %1129 = vmatmul.f32.gmra.mxu0 %v1938_v39  ;;  %v1210_v39 = vld [vmem:[#allocation8 + $0x440] sm:$0xff] }
 0x15e   :  { %564 = vmatmul.f32.gmra.mxu3 %v2045_v61  ;;  %804 = vmatmul.f32.gmra.mxu1 %v1970_v29 }
 0x15f   :  { %1225 = vmatpush.msra.mxu1 %v1210_v39 }
 0x160   :  { %v464_v11 = vpop.f32.mrf.mxu2 }
 0x161   :  { %v2051_v0 = vadd.f32 %v464_v11, %v399_v52  ;;  %1226 = vmatpush.msra.mxu1 %v1209_v8  ;;  %v984_v52 = vld [vmem:[#allocation8 + $0x350] sm:$0xff] }
 0x162   :  { %995 = vmatpush.msra.mxu3 %v984_v52 }
 0x163   :  { %v405_v1 = vpop.f32.mrf.mxu1  ;;  %1227 = vmatpush.msra.mxu1 %v1208_v13  ;;  %v977_v13 = vld [vmem:[#allocation8 + $0x318] sm:$0xff] }
 0x164   :  { %996 = vmatpush.msra.mxu3 %v983_v58  ;;  %v1580_v58 = vld [vmem:[#allocation3 + $0x50] sm:$0xff] }
 0x165   :  { %906 = vmatmul.f32.gmra.mxu2 %v2053_v3  ;;  %1132 = vmatmul.f32.gmra.mxu0 %v1943_v46  ;;  %v1207_v46 = vld [vmem:[#allocation8 + $0x428] sm:$0xff] }
 0x166   :  { %567 = vmatmul.f32.gmra.mxu3 %v2053_v3  ;;  %807 = vmatmul.f32.gmra.mxu1 %v1979_v49 }
 0x167   :  { %1228 = vmatpush.msra.mxu1 %v1207_v46  ;;  %v2117_v46 = vpop.f32.mrf.mxu0 }
 0x168   :  { %v467_v7 = vpop.f32.mrf.mxu2 }
 0x169   :  { %v2059_v18 = vadd.f32 %v467_v7, %v402_v59  ;;  %1229 = vmatpush.msra.mxu1 %v1206_v15  ;;  %v982_v59 = vld [vmem:[#allocation8 + $0x340] sm:$0xff]  ;;  %v975_v15 = vld [vmem:[#allocation8 + $0x308] sm:$0xff] }
 0x16a   :  { %997 = vmatpush.msra.mxu3 %v982_v59  ;;  %v978_v7 = vld [vmem:[#allocation8 + $0x320] sm:$0xff]  ;;  %v2153_v59 = vld [vmem:[#allocation2 + $0x112] sm:$0xff] }
 0x16b   :  { %v408_v10 = vpop.f32.mrf.mxu1  ;;  %1230 = vmatpush.msra.mxu1 %v1205_v21 }
 0x16c   :  { %998 = vmatpush.msra.mxu3 %v981_v32 }
 0x16d   :  { %909 = vmatmul.f32.gmra.mxu2 %v2061_v12  ;;  %1135 = vmatmul.f32.gmra.mxu0 %v1948_v53  ;;  %v1204_v53 = vld [vmem:[#allocation8 + $0x410] sm:$0xff] }
 0x16e   :  { %570 = vmatmul.f32.gmra.mxu3 %v2061_v12  ;;  %810 = vmatmul.f32.gmra.mxu1 %v1988_v5 }
 0x16f   :  { %1231 = vmatpush.msra.mxu1 %v1204_v53  ;;  %v2125_v53 = vld [vmem:[#allocation2 + $0xf2] sm:$0xff] }
 0x170   :  { %v470_v14 = vpop.f32.mrf.mxu2 }
 0x171   :  { %v2067_v16 = vadd.f32 %v470_v14, %v405_v1  ;;  %1232 = vmatpush.msra.mxu1 %v1203_v25  ;;  %v980_v1 = vld [vmem:[#allocation8 + $0x330] sm:$0xff] }
 0x172   :  { %999 = vmatpush.msra.mxu3 %v980_v1  ;;  %v1582_v1 = vld [vmem:[#allocation3 + $0x40] sm:$0xff] }
 0x173   :  { %v2069_v17 = vpop.f32.mrf.mxu1  ;;  %1233 = vmatpush.msra.mxu1 %v1202_v42 }
 0x175   :  { %912 = vmatmul.f32.gmra.mxu2 %v2071_v20  ;;  %1138 = vmatmul.f32.gmra.mxu0 %v1953_v60  ;;  %v850_v60 = vld [vmem:[#allocation2 + $0xb2] sm:$0xff] }
 0x176   :  { %573 = vmatmul.f32.gmra.mxu3 %v508_v19  ;;  %813 = vmatmul.f32.gmra.mxu1 %v1958_v9 }
 0x178   :  { %v473_v23 = vpop.f32.mrf.mxu2 }
 0x179   :  { %v2078_v31 = vadd.f32 %v473_v23, %v408_v10  ;;  %v2111_v10 = vld [vmem:[#allocation2 + $0xe2] sm:$0xff]  ;;  %v2133_v23 = vpop.f32.mrf.mxu0 }
 0x17b   :  { %v2080_v40 = vpop.f32.mrf.mxu1 }
 0x17d   :  { %915 = vmatmul.f32.gmra.mxu2 %v850_v60  ;;  %1141 = vmatmul.f32.gmra.mxu0 %v1078_v36 }
 0x17e   :  { %576 = vmatmul.f32.gmra.mxu3 %v850_v60  ;;  %816 = vmatmul.f32.gmra.mxu1 %v1968_v2 }
 0x180   :  { %v2083_v51 = vpop.f32.mrf.mxu2 }
 0x181   :  { %v2149_v47 = vpop.f32.mrf.mxu0 }
 0x183   :  { %v2087_v28 = vpop.f32.mrf.mxu1 }
 0x185   :  { %918 = vmatmul.f32.gmra.mxu2 %v2089_v56  ;;  %1144 = vmatmul.f32.gmra.mxu0 %v1970_v29  ;;  %v979_v29 = vld [vmem:[#allocation8 + $0x328] sm:$0xff] }
 0x186   :  { %579 = vmatmul.f32.gmra.mxu3 %v2089_v56  ;;  %819 = vmatmul.f32.gmra.mxu1 %v1977_v48 }
 0x187   :  { %1000 = vmatpush.msra.mxu3 %v979_v29  ;;  %v2163_v29 = vld [vmem:[#allocation2 + $0x122] sm:$0xff] }
 0x188   :  { %v2095_v62 = vpop.f32.mrf.mxu2 }
 0x189   :  { %1001 = vmatpush.msra.mxu3 %v978_v7 }
 0x18b   :  { %v2097_v11 = vpop.f32.mrf.mxu1  ;;  %1002 = vmatpush.msra.mxu3 %v977_v13  ;;  %v1583_v13 = vld [vmem:[#allocation3 + $0x38] sm:$0xff] }
 0x18d   :  { %921 = vmatmul.f32.gmra.mxu2 %v2099_v63  ;;  %1147 = vmatmul.f32.gmra.mxu0 %v1979_v49  ;;  %v976_v49 = vld [vmem:[#allocation8 + $0x310] sm:$0xff] }
 0x18e   :  { %582 = vmatmul.f32.gmra.mxu3 %v2099_v63  ;;  %822 = vmatmul.f32.gmra.mxu1 %v1986_v4 }
 0x18f   :  { %1003 = vmatpush.msra.mxu3 %v976_v49  ;;  %v2167_v49 = vpop.f32.mrf.mxu0 }
 0x190   :  { %v2107_v39 = vpop.f32.mrf.mxu2 }
 0x191   :  { %1004 = vmatpush.msra.mxu3 %v975_v15  ;;  %v453_v15 = vadd.f32 %v2018_v41, %v2008_v34  ;;  %v1588_v34 = vld [vmem:[#allocation3 + $0x10] sm:$0xff] }
 0x193   :  { %v2109_v8 = vpop.f32.mrf.mxu1 }
 0x195   :  { %924 = vmatmul.f32.gmra.mxu2 %v2111_v10  ;;  %1150 = vmatmul.f32.gmra.mxu0 %v1988_v5  ;;  %v974_v5 = vld [vmem:[#allocation8 + $0x300] sm:$0xff] }
 0x196   :  { %585 = vmatmul.f32.gmra.mxu3 %v2111_v10  ;;  %1234 = vmatmul.f32.vlgmr.msra.gmra.mxu1 %v2021_v43 }
 0x197   :  { %1005 = vmatpush.msra.mxu3 %v974_v5 }
 0x198   :  { %v2119_v14 = vpop.f32.mrf.mxu2 }
 0x199   :  { %v2121_v19 = vpop.f32.mrf.mxu3  ;;  %1368 = vmatpush.msrb.mxu3 %v1575_v22 }
 0x19b   :  { %v2123_v21 = vpop.f32.mrf.mxu1  ;;  %1369 = vmatpush.msrb.mxu3 %v1576_v27  ;;  %v1585_v27 = vld [vmem:[#allocation3 + $0x28] sm:$0xff] }
 0x19d   :  { %927 = vmatmul.f32.gmra.mxu2 %v2125_v53  ;;  %1153 = vmatmul.f32.gmra.mxu0 %v1958_v9  ;;  %v1577_v9 = vld [vmem:[#allocation3 + $0x68] sm:$0xff] }
 0x19e   :  { %588 = vmatmul.f32.gmra.mxu3 %v2125_v53  ;;  %1237 = vmatmul.f32.gmra.mxu1 %v2029_v50  ;;  %v1578_v50 = vld [vmem:[#allocation3 + $0x60] sm:$0xff] }
 0x19f   :  { %1370 = vmatpush.msrb.mxu3 %v1577_v9 }
 0x1a0   :  { %v2131_v43 = vpop.f32.mrf.mxu2 }
 0x1a1   :  { %v2135_v25 = vpop.f32.mrf.mxu3  ;;  %1371 = vmatpush.msrb.mxu3 %v1578_v50 }
 0x1a3   :  { %v2137_v36 = vpop.f32.mrf.mxu1  ;;  %1372 = vmatpush.msrb.mxu3 %v1579_v44  ;;  %v1586_v44 = vld [vmem:[#allocation3 + $0x20] sm:$0xff] }
 0x1a5   :  { %930 = vmatmul.f32.gmra.mxu2 %v2139_v38  ;;  %1156 = vmatmul.f32.gmra.mxu0 %v1968_v2  ;;  %v1581_v2 = vld [vmem:[#allocation3 + $0x48] sm:$0xff] }
 0x1a6   :  { %591 = vmatmul.f32.gmra.mxu3 %v2139_v38  ;;  %1240 = vmatmul.f32.gmra.mxu1 %v2037_v54 }
 0x1a7   :  { %1373 = vmatpush.msrb.mxu3 %v1580_v58  ;;  %v958_v58 = vld [vmem:[#allocation2 + $0x30] sm:$0xff] }
 0x1a8   :  { %v2145_v60 = vpop.f32.mrf.mxu2 }
 0x1a9   :  { %v2147_v42 = vpop.f32.mrf.mxu3  ;;  %1374 = vmatpush.msrb.mxu3 %v1581_v2  ;;  %v1587_v2 = vld [vmem:[#allocation3 + $0x18] sm:$0xff] }
 0x1ab   :  { %v2151_v52 = vpop.f32.mrf.mxu1  ;;  %1375 = vmatpush.msrb.mxu3 %v1582_v1 }
 0x1ad   :  { %933 = vmatmul.f32.gmra.mxu2 %v2153_v59  ;;  %1159 = vmatmul.f32.gmra.mxu0 %v1977_v48  ;;  %v957_v48 = vld [vmem:[#allocation2 + $0x20] sm:$0xff] }
 0x1ae   :  { %594 = vmatmul.f32.gmra.mxu3 %v2153_v59  ;;  %1243 = vmatmul.f32.gmra.mxu1 %v2045_v61  ;;  %v1584_v61 = vld [vmem:[#allocation3 + $0x30] sm:$0xff] }
 0x1af   :  { %1376 = vmatpush.msrb.mxu3 %v1583_v13 }
 0x1b0   :  { %v2159_v54 = vpop.f32.mrf.mxu2 }
 0x1b1   :  { %v2161_v32 = vpop.f32.mrf.mxu3  ;;  %1377 = vmatpush.msrb.mxu3 %v1584_v61 }
 0x1b3   :  { %v2165_v7 = vpop.f32.mrf.mxu1  ;;  %1378 = vmatpush.msrb.mxu3 %v1585_v27  ;;  %v959_v27 = vld [vmem:[#allocation2 + $0x40] sm:$0xff] }
 0x1b5   :  { %936 = vmatmul.f32.gmra.mxu2 %v2163_v29  ;;  %1162 = vmatmul.f32.gmra.mxu0 %v1986_v4 }
 0x1b6   :  { %1006 = vmatmul.f32.vlgmr.msra.gmra.mxu3 %v957_v48  ;;  %1246 = vmatmul.f32.gmra.mxu1 %v2053_v3  ;;  %v1589_v48 = vld [vmem:[#allocation3 + $0x8] sm:$0xff] }
 0x1b7   :  { %1379 = vmatpush.msrb.mxu3 %v1586_v44 }
 0x1b8   :  { %v2174_v5 = vpop.f32.mrf.mxu2 }
 0x1b9   :  { %v550_v22 = vpop.f32.mrf.mxu3  ;;  %1380 = vmatpush.msrb.mxu3 %v1587_v2  ;;  %v1192_v2 = vld [vmem:[#allocation2 + $0x92] sm:$0xff] }
 0x1ba   :  { %v598_v9 = vadd.f32 %v550_v22, %v453_v15  ;;  %v2184_v15 = vpop.f32.mrf.mxu0  ;;  %v1590_v22 = vld [vmem:[#allocation3] sm:$0xff] }
 0x1bb   :  { %v2176_v50 = vpop.f32.mrf.mxu1  ;;  %1381 = vmatpush.msrb.mxu3 %v1588_v34 }
 0x1bc   :  { %v712_v4 = vadd.f32 %v2076_v30, %v598_v9 }
 0x1bd   :  { %1382 = vmatpush.msrb.mxu3 %v1589_v48 }
 0x1be   :  { %v826_v3 = vadd.f32 %v2109_v8, %v712_v4  ;;  %1009 = vmatmul.f32.gmra.mxu3 %v958_v58  ;;  %1249 = vmatmul.f32.gmra.mxu1 %v2061_v12 }
 0x1bf   :  { %1383 = vmatpush.msrb.mxu3 %v1590_v22  ;;  %v961_v22 = vld [vmem:[#allocation2 + $0x60] sm:$0xff] }
 0x1c0   :  { %v892_v41 = vpop.f32.mrf.mxu2 }
 0x1c1   :  { %v2181_v1 = vadd.f32 %v892_v41, %v826_v3  ;;  %v553_v13 = vpop.f32.mrf.mxu3  ;;  %v960_v41 = vld [vmem:[#allocation2 + $0x50] sm:$0xff] }
 0x1c2   :  { %v599_v61 = vadd.f32 %v553_v13, %v2027_v45  ;;  %v2193_v34 = vpop.f32.mrf.mxu0 }
 0x1c3   :  { %v796_v30 = vpop.f32.mrf.mxu1 }
 0x1c4   :  { %v713_v8 = vadd.f32 %v2085_v55, %v599_v61 }
 0x1c6   :  { %v827_v12 = vadd.f32 %v2123_v21, %v713_v8  ;;  %1012 = vmatmul.f32.gmra.mxu3 %v959_v27  ;;  %1252 = vmatmul.f32.gmra.mxu1 %v2071_v20 }
 0x1c8   :  { %v895_v9 = vpop.f32.mrf.mxu2 }
 0x1c9   :  { %v2189_v44 = vadd.f32 %v895_v9, %v827_v12  ;;  %v556_v4 = vpop.f32.mrf.mxu3 }
 0x1ca   :  { %v600_v58 = vadd.f32 %v556_v4, %v2035_v24 }
 0x1cb   :  { %v799_v45 = vpop.f32.mrf.mxu1 }
 0x1cc   :  { %v714_v3 = vadd.f32 %v2101_v6, %v600_v58  ;;  %v691_v6 = vpop.f32.mrf.mxu0 }
 0x1ce   :  { %v828_v55 = vadd.f32 %v2137_v36, %v714_v3  ;;  %1015 = vmatmul.f32.gmra.mxu3 %v960_v41  ;;  %1255 = vmatmul.f32.gmra.mxu1 %v1192_v2 }
 0x1d0   :  { %v898_v21 = vpop.f32.mrf.mxu2 }
 0x1d1   :  { %v2196_v13 = vadd.f32 %v898_v21, %v828_v55  ;;  %v559_v20 = vpop.f32.mrf.mxu3 }
 0x1d2   :  { %v601_v48 = vadd.f32 %v559_v20, %v2043_v57  ;;  %v962_v57 = vld [vmem:[#allocation2 + $0x70] sm:$0xff] }
 0x1d3   :  { %v802_v61 = vpop.f32.mrf.mxu1 }
 0x1d4   :  { %v715_v24 = vadd.f32 %v2117_v46, %v601_v48 }
 0x1d6   :  { %v829_v8 = vadd.f32 %v2151_v52, %v715_v24  ;;  %1018 = vmatmul.f32.gmra.mxu3 %v961_v22  ;;  %1258 = vmatmul.f32.gmra.mxu1 %v2089_v56  ;;  %v694_v52 = vpop.f32.mrf.mxu0 }
 0x1d8   :  { %v901_v27 = vpop.f32.mrf.mxu2 }
 0x1d9   :  { %v2202_v36 = vadd.f32 %v901_v27, %v829_v8  ;;  %v562_v12 = vpop.f32.mrf.mxu3  ;;  %v2218_v27 = vld [vmem:[#allocation2] sm:$0xff] }
 0x1da   :  { %v602_v9 = vadd.f32 %v562_v12, %v2051_v0  ;;  %v963_v0 = vld [vmem:[#allocation2 + $0x80] sm:$0xff] }
 0x1db   :  { %v805_v4 = vpop.f32.mrf.mxu1 }
 0x1dc   :  { %v716_v58 = vadd.f32 %v2133_v23, %v602_v9 }
 0x1de   :  { %v830_v2 = vadd.f32 %v2165_v7, %v716_v58  ;;  %1021 = vmatmul.f32.gmra.mxu3 %v962_v57  ;;  %1261 = vmatmul.f32.gmra.mxu1 %v2099_v63  ;;  %v697_v24 = vpop.f32.mrf.mxu0  ;;  %v965_v58 = vld [vmem:[#allocation2 + $0xc0] sm:$0xff]  ;;  %v477_v57 = vadd.f32 %v2083_v51, %v2069_v17 }
 0x1e0   :  { %v904_v46 = vpop.f32.mrf.mxu2 }
 0x1e1   :  { %v2208_v3 = vadd.f32 %v904_v46, %v830_v2  ;;  %v565_v56 = vpop.f32.mrf.mxu3 }
 0x1e2   :  { %v603_v41 = vadd.f32 %v565_v56, %v2059_v18 }
 0x1e3   :  { %v808_v55 = vpop.f32.mrf.mxu1 }
 0x1e4   :  { %v717_v21 = vadd.f32 %v2149_v47, %v603_v41 }
 0x1e6   :  { %v831_v20 = vadd.f32 %v2176_v50, %v717_v21  ;;  %1024 = vmatmul.f32.gmra.mxu3 %v963_v0  ;;  %1264 = vmatmul.f32.gmra.mxu1 %v2111_v10 }
 0x1e8   :  { %v907_v23 = vpop.f32.mrf.mxu2 }
 0x1e9   :  { %v2214_v7 = vadd.f32 %v907_v23, %v831_v20  ;;  %v568_v63 = vpop.f32.mrf.mxu3 }
 0x1ea   :  { %v604_v48 = vadd.f32 %v568_v63, %v2067_v16  ;;  %v700_v16 = vpop.f32.mrf.mxu0  ;;  %v967_v63 = vld [vmem:[#allocation2 + $0xe0] sm:$0xff] }
 0x1eb   :  { %v811_v8 = vpop.f32.mrf.mxu1 }
 0x1ec   :  { %v718_v22 = vadd.f32 %v2167_v49, %v604_v48 }
 0x1ee   :  { %v832_v18 = vadd.f32 %v796_v30, %v718_v22  ;;  %1027 = vmatmul.f32.gmra.mxu3 %v2218_v27  ;;  %1267 = vmatmul.f32.gmra.mxu1 %v2125_v53 }
 0x1f0   :  { %v910_v47 = vpop.f32.mrf.mxu2 }
 0x1f1   :  { %v2222_v50 = vadd.f32 %v910_v47, %v832_v18  ;;  %v571_v10 = vpop.f32.mrf.mxu3 }
 0x1f2   :  { %v605_v12 = vadd.f32 %v571_v10, %v2078_v31  ;;  %v966_v31 = vld [vmem:[#allocation2 + $0xd0] sm:$0xff] }
 0x1f3   :  { %v814_v30 = vpop.f32.mrf.mxu1 }
 0x1f4   :  { %v719_v9 = vadd.f32 %v2184_v15, %v605_v12  ;;  %v703_v15 = vpop.f32.mrf.mxu0 }
 0x1f6   :  { %1030 = vmatmul.f32.gmra.mxu3 %v965_v58  ;;  %1270 = vmatmul.f32.gmra.mxu1 %v2139_v38  ;;  %v833_v49 = vadd.f32 %v799_v45, %v719_v9  ;;  %v480_v38 = vadd.f32 %v2095_v62, %v2080_v40 }
 0x1f8   :  { %v913_v2 = vpop.f32.mrf.mxu2 }
 0x1f9   :  { %v2229_v53 = vadd.f32 %v913_v2, %v833_v49  ;;  %v574_v46 = vpop.f32.mrf.mxu3 }
 0x1fa   :  { %v606_v56 = vadd.f32 %v574_v46, %v477_v57 }
 0x1fb   :  { %v817_v17 = vpop.f32.mrf.mxu1 }
 0x1fc   :  { %v720_v41 = vadd.f32 %v2193_v34, %v606_v56  ;;  %v706_v34 = vpop.f32.mrf.mxu0 }
 0x1fe   :  { %v834_v21 = vadd.f32 %v802_v61, %v720_v41  ;;  %1033 = vmatmul.f32.gmra.mxu3 %v966_v31  ;;  %1273 = vmatmul.f32.gmra.mxu1 %v2153_v59  ;;  %v483_v59 = vadd.f32 %v2107_v39, %v2087_v28  ;;  %v489_v39 = vadd.f32 %v2131_v43, %v2121_v19 }
 0x1ff   :  { %v495_v43 = vadd.f32 %v2159_v54, %v2147_v42 }
 0x200   :  { %v916_v45 = vpop.f32.mrf.mxu2 }
 0x201   :  { %v2235_v0 = vadd.f32 %v916_v45, %v834_v21  ;;  %v577_v51 = vpop.f32.mrf.mxu3 }
 0x202   :  { %v607_v20 = vadd.f32 %v577_v51, %v480_v38 }
 0x203   :  { %v820_v40 = vpop.f32.mrf.mxu1 }
 0x204   :  { %v721_v23 = vadd.f32 %v691_v6, %v607_v20  ;;  %v486_v6 = vadd.f32 %v2119_v14, %v2097_v11  ;;  %v709_v10 = vpop.f32.mrf.mxu0 }
 0x206   :  { %v2237_v48 = vadd.f32 %v805_v4, %v721_v23  ;;  %1036 = vmatmul.f32.gmra.mxu3 %v967_v63  ;;  %1276 = vmatmul.f32.gmra.mxu1 %v2163_v29  ;;  %v1086_v29 = vld [vmem:[#allocation2 + $0x131] sm:$0xff] }
 0x207   :  { %1165 = vmatmul.f32.gmra.mxu0 %v1086_v29 }
 0x209   :  { %v580_v61 = vpop.f32.mrf.mxu3 }
 0x20a   :  { %v608_v22 = vadd.f32 %v580_v61, %v483_v59 }
 0x20b   :  { %v823_v9 = vpop.f32.mrf.mxu1 }
 0x20c   :  { %v722_v62 = vadd.f32 %v694_v52, %v608_v22  ;;  %v1121_v11 = vpop.f32.mrf.mxu0 }
 0x20e   :  { %v2242_v18 = vadd.f32 %v808_v55, %v722_v62  ;;  %1039 = vmatmul.f32.gmra.mxu3 %v1996_v26  ;;  %v1200_v55 = vld [vmem:[#allocation2 + $0x132] sm:$0xff] }
 0x20f   :  { %1279 = vmatmul.f32.gmra.mxu1 %v1200_v55 }
 0x211   :  { %v583_v4 = vpop.f32.mrf.mxu3 }
 0x212   :  { %v609_v47 = vadd.f32 %v583_v4, %v486_v6 }
 0x214   :  { %v723_v12 = vadd.f32 %v697_v24, %v609_v47  ;;  %v1235_v24 = vpop.f32.mrf.mxu1  ;;  %v1124_v19 = vpop.f32.mrf.mxu0 }
 0x216   :  { %v2247_v28 = vadd.f32 %v811_v8, %v723_v12  ;;  %1042 = vmatmul.f32.gmra.mxu3 %v2002_v33  ;;  %v492_v8 = vadd.f32 %v2145_v60, %v2135_v25  ;;  %v498_v25 = vadd.f32 %v2174_v5, %v2161_v32 }
 0x219   :  { %v586_v52 = vpop.f32.mrf.mxu3 }
 0x21a   :  { %v610_v26 = vadd.f32 %v586_v52, %v489_v39 }
 0x21c   :  { %v724_v58 = vadd.f32 %v700_v16, %v610_v26  ;;  %v1238_v16 = vpop.f32.mrf.mxu1  ;;  %v1127_v60 = vpop.f32.mrf.mxu0 }
 0x21e   :  { %v2252_v14 = vadd.f32 %v814_v30, %v724_v58  ;;  %1045 = vmatmul.f32.gmra.mxu3 %v2010_v35 }
 0x221   :  { %v589_v49 = vpop.f32.mrf.mxu3 }
 0x222   :  { %v611_v57 = vadd.f32 %v589_v49, %v492_v8 }
 0x224   :  { %v725_v33 = vadd.f32 %v703_v15, %v611_v57  ;;  %v1241_v21 = vpop.f32.mrf.mxu1  ;;  %v1130_v54 = vpop.f32.mrf.mxu0 }
 0x226   :  { %v2257_v2 = vadd.f32 %v817_v17, %v725_v33  ;;  %1048 = vmatmul.f32.gmra.mxu3 %v2015_v37  ;;  %v919_v33 = vpop.f32.mrf.mxu2 }
 0x229   :  { %v592_v30 = vpop.f32.mrf.mxu3 }
 0x22a   :  { %v612_v46 = vadd.f32 %v592_v30, %v495_v43 }
 0x22c   :  { %v726_v56 = vadd.f32 %v706_v34, %v612_v46  ;;  %v1244_v17 = vpop.f32.mrf.mxu1  ;;  %v1133_v32 = vpop.f32.mrf.mxu0 }
 0x22e   :  { %v2262_v35 = vadd.f32 %v820_v40, %v726_v56  ;;  %1051 = vmatmul.f32.gmra.mxu3 %v2218_v27 }
 0x231   :  { %v595_v41 = vpop.f32.mrf.mxu3 }
 0x232   :  { %v613_v31 = vadd.f32 %v595_v41, %v498_v25 }
 0x234   :  { %v727_v37 = vadd.f32 %v709_v10, %v613_v31  ;;  %v1247_v63 = vpop.f32.mrf.mxu1 }
 0x236   :  { %v2267_v15 = vadd.f32 %v823_v9, %v727_v37 }
 0x239   :  { %v1007_v38 = vpop.f32.mrf.mxu3 }
 0x23a   :  { %v1055_v42 = vadd.f32 %v1007_v38, %v2181_v1  ;;  %v1136_v1 = vpop.f32.mrf.mxu0 }
 0x23c   :  { %v1169_v45 = vadd.f32 %v1121_v11, %v1055_v42  ;;  %v1250_v40 = vpop.f32.mrf.mxu1 }
 0x23e   :  { %v2270_v51 = vadd.f32 %v1235_v24, %v1169_v45 }
 0x241   :  { %v1010_v20 = vpop.f32.mrf.mxu3 }
 0x242   :  { %v1056_v27 = vadd.f32 %v1010_v20, %v2189_v44  ;;  %v1139_v44 = vpop.f32.mrf.mxu0 }
 0x244   :  { %v1170_v23 = vadd.f32 %v1124_v19, %v1056_v27  ;;  %v1253_v29 = vpop.f32.mrf.mxu1 }
 0x246   :  { %v2273_v5 = vadd.f32 %v1238_v16, %v1170_v23 }
 0x249   :  { %v1013_v59 = vpop.f32.mrf.mxu3 }
 0x24a   :  { %v1057_v34 = vadd.f32 %v1013_v59, %v2196_v13  ;;  %v1142_v55 = vpop.f32.mrf.mxu0 }
 0x24c   :  { %v1171_v61 = vadd.f32 %v1127_v60, %v1057_v34  ;;  %v1256_v58 = vpop.f32.mrf.mxu1  ;;  %v922_v60 = vpop.f32.mrf.mxu2 }
 0x24e   :  { %v2276_v22 = vadd.f32 %v1241_v21, %v1171_v61 }
 0x251   :  { %v1016_v62 = vpop.f32.mrf.mxu3 }
 0x252   :  { %v1058_v6 = vadd.f32 %v1016_v62, %v2202_v36  ;;  %v1145_v49 = vpop.f32.mrf.mxu0 }
 0x254   :  { %v1172_v4 = vadd.f32 %v1130_v54, %v1058_v6  ;;  %v925_v38 = vpop.f32.mrf.mxu2 }
 0x256   :  { %v2279_v47 = vadd.f32 %v1244_v17, %v1172_v4 }
 0x259   :  { %v1019_v10 = vpop.f32.mrf.mxu3 }
 0x25a   :  { %v1059_v12 = vadd.f32 %v1019_v10, %v2208_v3  ;;  %v1259_v3 = vpop.f32.mrf.mxu1 }
 0x25c   :  { %v1173_v9 = vadd.f32 %v1133_v32, %v1059_v12  ;;  %v928_v45 = vpop.f32.mrf.mxu2 }
 0x25d   :  { %v952_v10 = vadd.f32 %v928_v45, %v2252_v14 }
 0x25e   :  { %v2282_v39 = vadd.f32 %v1247_v63, %v1173_v9 }
 0x261   :  { %v1022_v13 = vpop.f32.mrf.mxu3 }
 0x262   :  { %v1060_v52 = vadd.f32 %v1022_v13, %v2214_v7  ;;  %v1148_v7 = vpop.f32.mrf.mxu0  ;;  %v2293_v46 = vpop.f32.mrf.mxu1 }
 0x264   :  { %v1174_v26 = vadd.f32 %v1136_v1, %v1060_v52  ;;  %v931_v23 = vpop.f32.mrf.mxu2 }
 0x265   :  { %v953_v6 = vadd.f32 %v931_v23, %v2257_v2  ;;  %v949_v2 = vadd.f32 %v919_v33, %v2237_v48 }
 0x266   :  { %v2285_v11 = vadd.f32 %v1250_v40, %v1174_v26 }
 0x269   :  { %v1025_v36 = vpop.f32.mrf.mxu3 }
 0x26a   :  { %v1061_v24 = vadd.f32 %v1025_v36, %v2222_v50  ;;  %v1151_v31 = vpop.f32.mrf.mxu0  ;;  %v1265_v37 = vpop.f32.mrf.mxu1 }
 0x26c   :  { %v1175_v8 = vadd.f32 %v1139_v44, %v1061_v24  ;;  %v934_v34 = vpop.f32.mrf.mxu2 }
 0x26d   :  { %v954_v40 = vadd.f32 %v934_v34, %v2262_v35 }
 0x26e   :  { %v2288_v57 = vadd.f32 %v1253_v29, %v1175_v8  ;;  %v951_v29 = vadd.f32 %v925_v38, %v2247_v28 }
 0x271   :  { %v1028_v19 = vpop.f32.mrf.mxu3 }
 0x272   :  { %v1062_v43 = vadd.f32 %v1028_v19, %v2229_v53  ;;  %v1154_v54 = vpop.f32.mrf.mxu0  ;;  %v1268_v53 = vpop.f32.mrf.mxu1 }
 0x274   :  { %v1176_v16 = vadd.f32 %v1142_v55, %v1062_v43  ;;  %v937_v44 = vpop.f32.mrf.mxu2 }
 0x275   :  { %v955_v9 = vadd.f32 %v937_v44, %v2267_v15 }
 0x276   :  { %v2291_v30 = vadd.f32 %v1256_v58, %v1176_v16  ;;  %v950_v58 = vadd.f32 %v922_v60, %v2242_v18 }
 0x279   :  { %v1031_v56 = vpop.f32.mrf.mxu3 }
 0x27a   :  { %v1063_v25 = vadd.f32 %v1031_v56, %v2235_v0  ;;  %v1157_v20 = vpop.f32.mrf.mxu0  ;;  %v1271_v27 = vpop.f32.mrf.mxu1  ;;  %v1572_v56 = vld [vmem:[%s2350_s4] ss:$0 sm:$0xff] }
 0x27c   :  { %v1177_v50 = vadd.f32 %v1145_v49, %v1063_v25 }
 0x27e   :  { %v2296_v41 = vadd.f32 %v1259_v3, %v1177_v50 }
 0x281   :  { %v1034_v21 = vpop.f32.mrf.mxu3 }
 0x282   :  { %v1160_v63 = vpop.f32.mrf.mxu0  ;;  %v1274_v59 = vpop.f32.mrf.mxu1  ;;  %v1064_v43 = vadd.f32 %v1034_v21, %v949_v2  ;;  %v1454_v2 = vld [vmem:[#allocation11 + $0x40] sm:$0xff] }
 0x284   :  { %v1178_v38 = vadd.f32 %v1148_v7, %v1064_v43  ;;  %v2312_v7 = vld [vmem:[#allocation12 + $0x8] sm:$0xff] }
 0x285   :  { %v1451_v43 = vld [vmem:[#allocation11 + $0x28] sm:$0xff] }
 0x289   :  { %v1037_v42 = vpop.f32.mrf.mxu3 }
 0x28a   :  { %v1163_v61 = vpop.f32.mrf.mxu0  ;;  %v1277_v62 = vpop.f32.mrf.mxu1  ;;  %v1065_v49 = vadd.f32 %v1037_v42, %v950_v58  ;;  %v2308_v42 = vld [vmem:[#allocation12] sm:$0xff]  ;;  %v1457_v58 = vld [vmem:[#allocation11 + $0x58] sm:$0xff] }
 0x28b   :  { %1384 = vmatmul.f32.vlgmr.msrb.gmra.mxu3 %v2308_v42 }
 0x28c   :  { %v1179_v25 = vadd.f32 %v1151_v31, %v1065_v49  ;;  %v1453_v49 = vld [vmem:[#allocation11 + $0x38] sm:$0xff] }
 0x28e   :  { %v1293_v21 = vadd.f32 %v1265_v37, %v1179_v25  ;;  %v1403_v25 = vld [vmem:[#allocation9 + $0x30] sm:$0xff] }
 0x291   :  { %v1040_v17 = vpop.f32.mrf.mxu3 }
 0x292   :  { %v1166_v26 = vpop.f32.mrf.mxu0  ;;  %v1066_v36 = vadd.f32 %v1040_v17, %v951_v29  ;;  %v1280_v8 = vpop.f32.mrf.mxu1  ;;  %v1461_v29 = vld [vmem:[#allocation11 + $0x78] sm:$0xff] }
 0x293   :  { %1387 = vmatmul.f32.gmra.mxu3 %v2312_v7 }
 0x294   :  { %v1180_v28 = vadd.f32 %v1154_v54, %v1066_v36  ;;  %1466 = vmatpush.msra.mxu3 %v1461_v29  ;;  %v1456_v36 = vld [vmem:[#allocation11 + $0x50] sm:$0xff] }
 0x296   :  { %v1294_v45 = vadd.f32 %v1268_v53, %v1180_v28  ;;  %v1405_v28 = vld [vmem:[#allocation9 + $0x40] sm:$0xff] }
 0x298   :  { %v1314_v31 = vadd.f32 %v1572_v56, %v1294_v45  ;;  %v1446_v45 = vld [vmem:[#allocation11] sm:$0xff] }
 0x299   :  { %v1043_v32 = vpop.f32.mrf.mxu3 }
 0x29a   :  { %v1067_v13 = vadd.f32 %v1043_v32, %v952_v10  ;;  %v1313_v32 = vadd.f32 %v1572_v56, %v1293_v21  ;;  %v1330_v53 = vmax.f32 %v1314_v31, 0.0  ;;  %v2325_v10 = vld [vmem:[#allocation12 + $0x18] sm:$0xff]  ;;  %v1397_v21 = vld [vmem:[#allocation9] sm:$0xff] }
 0x29c   :  { %v1181_v3 = vadd.f32 %v1157_v20, %v1067_v13  ;;  %v1292_v20 = vadd.f32 %v2293_v46, %v1178_v38  ;;  %v1329_v37 = vmax.f32 %v1313_v32, 0.0  ;;  %v1310_v46 = vadd.f32 %v1572_v56, %v2291_v30  ;;  %v1460_v13 = vld [vmem:[#allocation11 + $0x70] sm:$0xff]  ;;  %v1401_v38 = vld [vmem:[#allocation9 + $0x20] sm:$0xff] }
 0x29d   :  { %v1306_v30 = vadd.f32 %v1572_v56, %v2279_v47  ;;  %v1459_v47 = vld [vmem:[#allocation11 + $0x68] sm:$0xff]  ;;  %1467 = vmatpush.msra.mxu3 %v1460_v13 }
 0x29e   :  { %v1295_v18 = vadd.f32 %v1271_v27, %v1181_v3  ;;  %v1407_v3 = vld [vmem:[#allocation9 + $0x50] sm:$0xff] }
 0x29f   :  { %1468 = vmatpush.msra.mxu3 %v1459_v47 }
 0x2a0   :  { %v1315_v17 = vadd.f32 %v1572_v56, %v1295_v18  ;;  %v1448_v18 = vld [vmem:[#allocation11 + $0x10] sm:$0xff] }
 0x2a1   :  { %v1046_v0 = vpop.f32.mrf.mxu3 }
 0x2a2   :  { %v1068_v12 = vadd.f32 %v1046_v0, %v953_v6  ;;  %v1331_v27 = vmax.f32 %v1315_v17, 0.0 }
 0x2a4   :  { %v1182_v35 = vadd.f32 %v1160_v63, %v1068_v12  ;;  %v1312_v63 = vadd.f32 %v1572_v56, %v1292_v20  ;;  %v1322_v12 = vmax.f32 %v1306_v30, 0.0 }
 0x2a6   :  { %v1296_v16 = vadd.f32 %v1274_v59, %v1182_v35  ;;  %v1311_v59 = vadd.f32 %v1572_v56, %v2296_v41  ;;  %v1328_v0 = vmax.f32 %v1312_v63, 0.0  ;;  %v1307_v41 = vadd.f32 %v1572_v56, %v2282_v39  ;;  %v1455_v35 = vld [vmem:[#allocation11 + $0x48] sm:$0xff]  ;;  %v1574_v63 = vld [vmem:[%s2354_s8] ss:$0 sm:$0xff] }
 0x2a7   :  { %v1303_v39 = vadd.f32 %v1572_v56, %v2270_v51  ;;  %v1410_v51 = vld [vmem:[#allocation9 + $0x68] sm:$0xff] }
 0x2a8   :  { %v1316_v33 = vadd.f32 %v1572_v56, %v1296_v16  ;;  %v1327_v34 = vmax.f32 %v1311_v59, 0.0  ;;  %v1323_v44 = vmax.f32 %v1307_v41, 0.0  ;;  %v1450_v16 = vld [vmem:[#allocation11 + $0x20] sm:$0xff] }
 0x2a9   :  { %v1049_v1 = vpop.f32.mrf.mxu3 }
 0x2aa   :  { %v1069_v4 = vadd.f32 %v1049_v1, %v954_v40  ;;  %v1332_v23 = vmax.f32 %v1316_v33, 0.0  ;;  %v2318_v1 = vld [vmem:[#allocation12 + $0x10] sm:$0xff]  ;;  %v1326_v40 = vmax.f32 %v1310_v46, 0.0 }
 0x2ab   :  { %1390 = vmatmul.f32.gmra.mxu3 %v2318_v1  ;;  %v1399_v33 = vld [vmem:[#allocation9 + $0x10] sm:$0xff] }
 0x2ac   :  { %v1183_v52 = vadd.f32 %v1163_v61, %v1069_v4  ;;  %v1309_v61 = vadd.f32 %v1572_v56, %v2288_v57  ;;  %v1305_v57 = vadd.f32 %v1572_v56, %v2276_v22  ;;  %v1458_v22 = vld [vmem:[#allocation11 + $0x60] sm:$0xff] }
 0x2ad   :  { %1469 = vmatpush.msra.mxu3 %v1458_v22 }
 0x2ae   :  { %v1297_v14 = vadd.f32 %v1277_v62, %v1183_v52  ;;  %v1308_v62 = vadd.f32 %v1572_v56, %v2285_v11  ;;  %v1325_v6 = vmax.f32 %v1309_v61, 0.0  ;;  %v1304_v11 = vadd.f32 %v1572_v56, %v2273_v5  ;;  %v1411_v5 = vld [vmem:[#allocation9 + $0x70] sm:$0xff] }
 0x2af   :  { %1470 = vmatpush.msra.mxu3 %v1457_v58 }
 0x2b0   :  { %v1317_v50 = vadd.f32 %v1572_v56, %v1297_v14  ;;  %v1324_v4 = vmax.f32 %v1308_v62, 0.0  ;;  %v1320_v52 = vmax.f32 %v1304_v11, 0.0  ;;  %v1452_v14 = vld [vmem:[#allocation11 + $0x30] sm:$0xff] }
 0x2b1   :  { %v1052_v55 = vpop.f32.mrf.mxu3  ;;  %1471 = vmatpush.msra.mxu3 %v1456_v36 }
 0x2b2   :  { %v1070_v24 = vadd.f32 %v1052_v55, %v955_v9  ;;  %v1333_v54 = vmax.f32 %v1317_v50, 0.0  ;;  %v1321_v9 = vmax.f32 %v1305_v57, 0.0  ;;  %v1319_v55 = vmax.f32 %v1303_v39, 0.0  ;;  %v1447_v50 = vld [vmem:[#allocation11 + $0x8] sm:$0xff] }
 0x2b3   :  { %1393 = vmatmul.f32.gmra.mxu3 %v2325_v10 }
 0x2b4   :  { %v1184_v19 = vadd.f32 %v1166_v26, %v1070_v24  ;;  %v1412_v26 = vld [vmem:[#allocation9 + $0x78] sm:$0xff]  ;;  %v1409_v24 = vld [vmem:[#allocation9 + $0x60] sm:$0xff]  ;;  %1472 = vmatpush.msra.mxu3 %v1455_v35 }
 0x2b6   :  { %v1298_v15 = vadd.f32 %v1280_v8, %v1184_v19  ;;  %v1408_v8 = vld [vmem:[#allocation9 + $0x58] sm:$0xff]  ;;  %1473 = vmatpush.msra.mxu3 %v1454_v2  ;;  %v1406_v19 = vld [vmem:[#allocation9 + $0x48] sm:$0xff] }
 0x2b8   :  { %v1318_v60 = vadd.f32 %v1572_v56, %v1298_v15  ;;  %1474 = vmatpush.msra.mxu3 %v1453_v49  ;;  %v1404_v15 = vld [vmem:[#allocation9 + $0x38] sm:$0xff] }
 0x2b9   :  { %v1449_v56 = vld [vmem:[#allocation11 + $0x18] sm:$0xff] }
 0x2ba   :  { %v1334_v48 = vmax.f32 %v1318_v60, 0.0  ;;  %1475 = vmatpush.msra.mxu3 %v1452_v14  ;;  %v1402_v60 = vld [vmem:[#allocation9 + $0x28] sm:$0xff] }
 0x2bc   :  { %1339 = vmatpush.msrb.mxu2 %v1334_v48  ;;  %1476 = vmatpush.msra.mxu3 %v1451_v43  ;;  %v1400_v48 = vld [vmem:[#allocation9 + $0x18] sm:$0xff] }
 0x2be   :  { %1340 = vmatpush.msrb.mxu2 %v1333_v54  ;;  %1477 = vmatpush.msra.mxu3 %v1450_v16 }
 0x2c0   :  { %1341 = vmatpush.msrb.mxu2 %v1332_v23  ;;  %1478 = vmatpush.msra.mxu3 %v1449_v56 }
 0x2c2   :  { %1342 = vmatpush.msrb.mxu2 %v1331_v27  ;;  %1479 = vmatpush.msra.mxu3 %v1448_v18 }
 0x2c4   :  { %1343 = vmatpush.msrb.mxu2 %v1330_v53  ;;  %1480 = vmatpush.msra.mxu3 %v1447_v50 }
 0x2c6   :  { %1344 = vmatpush.msrb.mxu2 %v1329_v37  ;;  %1481 = vmatpush.msra.mxu3 %v1446_v45  ;;  %v1573_v37 = vld [vmem:[%s2352_s6] ss:$0 sm:$0xff]  ;;  %s1779_s6 = smov [#allocation14]  }
 0x2c7   :  { %s1511_s8 = sshll.u32 %s1779_s6, 4  ;;  %s1512_s8 = int_to_ptr.vmem [resolvable:$true] %s1511_s8 }
 0x2c8   :  { %1345 = vmatpush.msrb.mxu2 %v1328_v0 }
 0x2ca   :  { %1346 = vmatpush.msrb.mxu2 %v1327_v34 }
 0x2cc   :  { %1347 = vmatpush.msrb.mxu2 %v1326_v40 }
 0x2ce   :  { %1348 = vmatpush.msrb.mxu2 %v1325_v6 }
 0x2d0   :  { %1349 = vmatpush.msrb.mxu2 %v1324_v4 }
 0x2d2   :  { %1350 = vmatpush.msrb.mxu2 %v1323_v44 }
 0x2d4   :  { %1351 = vmatpush.msrb.mxu2 %v1322_v12 }
 0x2d6   :  { %1352 = vmatpush.msrb.mxu2 %v1321_v9 }
 0x2d8   :  { %1353 = vmatpush.msrb.mxu2 %v1320_v52 }
 0x2da   :  { %1354 = vmatpush.msrb.mxu2 %v1319_v55 }
 0x2db   :  { %1355 = vmatmul.f32.vlgmr.msrb.gmra.mxu2 %v2308_v42  ;;  %v1398_v42 = vld [vmem:[#allocation9 + $0x8] sm:$0xff] }
 0x2dc   :  { %1417 = vmatpush.msra.mxu2 %v1412_v26 }
 0x2de   :  { %1418 = vmatpush.msra.mxu2 %v1411_v5 }
 0x2e0   :  { %1419 = vmatpush.msra.mxu2 %v1410_v51 }
 0x2e2   :  { %1420 = vmatpush.msra.mxu2 %v1409_v24 }
 0x2e3   :  { %1358 = vmatmul.f32.gmra.mxu2 %v2312_v7 }
 0x2e4   :  { %1421 = vmatpush.msra.mxu2 %v1408_v8 }
 0x2e6   :  { %1422 = vmatpush.msra.mxu2 %v1407_v3 }
 0x2e8   :  { %1423 = vmatpush.msra.mxu2 %v1406_v19 }
 0x2ea   :  { %1424 = vmatpush.msra.mxu2 %v1405_v28 }
 0x2eb   :  { %1361 = vmatmul.f32.gmra.mxu2 %v2318_v1 }
 0x2ec   :  { %1425 = vmatpush.msra.mxu2 %v1404_v15 }
 0x2ee   :  { %1426 = vmatpush.msra.mxu2 %v1403_v25 }
 0x2f0   :  { %1427 = vmatpush.msra.mxu2 %v1402_v60 }
 0x2f2   :  { %1428 = vmatpush.msra.mxu2 %v1401_v38 }
 0x2f3   :  { %1364 = vmatmul.f32.gmra.mxu2 %v2325_v10 }
 0x2f4   :  { %1429 = vmatpush.msra.mxu2 %v1400_v48 }
 0x2f6   :  { %1430 = vmatpush.msra.mxu2 %v1399_v33 }
 0x2f8   :  { %1431 = vmatpush.msra.mxu2 %v1398_v42 }
 0x2fa   :  { %1432 = vmatpush.msra.mxu2 %v1397_v21 }
 0x30e   :  { %v1385_v54 = vpop.f32.mrf.mxu3 }
 0x30f   :  { %1482 = vmatmul.f32.vlgmr.msra.gmra.mxu3 %v1385_v54 }
 0x316   :  { %v1388_v17 = vpop.f32.mrf.mxu3 }
 0x317   :  { %1485 = vmatmul.f32.gmra.mxu3 %v1388_v17 }
 0x32e   :  { %v1391_v20 = vpop.f32.mrf.mxu3 }
 0x32f   :  { %1488 = vmatmul.f32.gmra.mxu3 %v1391_v20 }
 0x336   :  { %v1394_v23 = vpop.f32.mrf.mxu3 }
 0x337   :  { %1491 = vmatmul.f32.gmra.mxu3 %v1394_v23 }
 0x35e   :  { %v1356_v31 = vpop.f32.mrf.mxu2 }
 0x35f   :  { %1433 = vmatmul.f32.vlgmr.msra.gmra.mxu2 %v1356_v31 }
 0x366   :  { %v1359_v27 = vpop.f32.mrf.mxu2 }
 0x367   :  { %1436 = vmatmul.f32.gmra.mxu2 %v1359_v27 }
 0x36e   :  { %v1362_v32 = vpop.f32.mrf.mxu2 }
 0x36f   :  { %1439 = vmatmul.f32.gmra.mxu2 %v1362_v32 }
 0x376   :  { %v1365_v7 = vpop.f32.mrf.mxu2 }
 0x377   :  { %1442 = vmatmul.f32.gmra.mxu2 %v1365_v7 }
 0x392   :  { %v1483_v53 = vpop.f32.mrf.mxu3 }
 0x393   :  { %v1484_v59 = vadd.f32 %v1574_v63, %v1483_v53 }
 0x39a   :  { %v1486_v46 = vpop.f32.mrf.mxu3 }
 0x39b   :  { %v1487_v40 = vadd.f32 %v1574_v63, %v1486_v46 }
 0x3b2   :  { %v1489_v41 = vpop.f32.mrf.mxu3 }
 0x3b3   :  { %v1490_v44 = vadd.f32 %v1574_v63, %v1489_v41 }
 0x3ba   :  { %v1492_v11 = vpop.f32.mrf.mxu3 }
 0x3bb   :  { %v1493_v9 = vadd.f32 %v1574_v63, %v1492_v11 }
 0x3e2   :  { %v1434_v0 = vpop.f32.mrf.mxu2 }
 0x3e3   :  { %v1435_v34 = vadd.f32 %v1573_v37, %v1434_v0 }
 0x3e5   :  { %v1495_v61 = vadd.f32 %v1484_v59, %v1435_v34 }
 0x3e7   :  { %v1499_v1 = vmax.f32 %v1495_v61, 0.0 }
 0x3e9   :  { %1503 = vst [vmem:[#allocation14] sm:$0xff] %v1499_v1 }
 0x3ea   :  { %v1437_v62 = vpop.f32.mrf.mxu2 }
 0x3eb   :  { %v1438_v6 = vadd.f32 %v1573_v37, %v1437_v62 }
 0x3ed   :  { %v1496_v4 = vadd.f32 %v1487_v40, %v1438_v6 }
 0x3ef   :  { %v1500_v30 = vmax.f32 %v1496_v4, 0.0 }
 0x3f1   :  { %1504 = vst [vmem:[#allocation14 + $0x8] sm:$0xff] %v1500_v30 }
 0x3f2   :  { %v1440_v57 = vpop.f32.mrf.mxu2 }
 0x3f3   :  { %v1441_v10 = vadd.f32 %v1573_v37, %v1440_v57 }
 0x3f5   :  { %v1497_v12 = vadd.f32 %v1490_v44, %v1441_v10 }
 0x3f7   :  { %v1501_v29 = vmax.f32 %v1497_v12, 0.0 }
 0x3f9   :  { %1505 = vst [vmem:[#allocation14 + $0x10] sm:$0xff] %v1501_v29 }
 0x3fa   :  { %v1443_v39 = vpop.f32.mrf.mxu2 }
 0x3fb   :  { %v1444_v13 = vadd.f32 %v1573_v37, %v1443_v39 }
 0x3fd   :  { %v1498_v47 = vadd.f32 %v1493_v9, %v1444_v13 }
 0x3ff   :  { %v1502_v52 = vmax.f32 %v1498_v47, 0.0 }
 0x401   :  { %1506 = vst [vmem:[#allocation14 + $0x18] sm:$0xff] %v1502_v52 }
 0x402   :  { %1519 = dma.vmem_to_hbm [thread:$0]  %s1512_s8, 512, %s1514_s27, [#allocation5], %s1771_s21, %s1771_s21, %s1772_s22  }
 0x403   :  { %1768 = dma.done.wait [#allocation5], 512  }
 0x404   :  { %1769 = vsyncadd [#allocation5], 4294966784 }
 0x405   :  { %1524 = vsyncpa [#allocation4], 1 }
 0x406   :  { %1525 = vsyncpa [#allocation7], 1 }
 0x407   :  { %1526 = vsyncpa [#allocation10], 1 }
 0x408   :  { %1527 = vsyncpa [#allocation13], 1 }
 0x409   :  { %1528 = vsyncpa [#allocation5], 1 }

</bundles_post_ra>
